<compile_context>
chip_gen: v5e
topology: v5e:2x2
jax: 0.10.0
libtpu: 0.0.40
codegen_flags: <defaults>
</compile_context>

<pallas_src>
import numpy as np

import jax
import jax.numpy as jnp
from jax.experimental import pallas as pl
from jax.experimental.pallas import tpu as pltpu


PARAM_DTYPE = jnp.bfloat16   # banded conv matrices + matmul LHS (f32 accumulate)


# ----------------------------------------------------------------------------
# In-kernel helpers (activations are (B_TILE*H, W*C) f32, lane-dense)
# ----------------------------------------------------------------------------
def _conv_rows(v2, m_ref, bt, h):
    """3x3 conv, pad=1, stride=1 on a (bt*h, W*C) value as ONE MXU matmul.

    LHS = [row_above | row | row_below] lane-concat (zero-padded per image at
    the H edges); RHS = host-precomputed banded matrix (3*W*Cin, W*Cout)."""
    wc = v2.shape[-1]
    v3 = v2.reshape(bt, h, wc)
    zero = jnp.zeros((bt, 1, wc), v2.dtype)
    above = jnp.concatenate([zero, v3[:, :-1, :]], axis=1)   # out row h <- in row h-1 (kh=0)
    below = jnp.concatenate([v3[:, 1:, :], zero], axis=1)    # out row h <- in row h+1 (kh=2)
    lhs = jnp.concatenate([above, v3, below], axis=-1).reshape(bt * h, 3 * wc)
    return jnp.dot(lhs.astype(PARAM_DTYPE), m_ref[...],
                   preferred_element_type=jnp.float32)


def _make_encoder_kernel(num_levels):
    """num_levels = len(in_channels_ls) - 1 (number of sblock + down-conv pairs)."""

    def kernel(*refs):
        x_refs = refs[:num_levels]
        p_refs = refs[num_levels:num_levels + 7 * num_levels]
        o_refs = refs[num_levels + 7 * num_levels:]

        pre = None
        for i in range(num_levels):
            m, s1, b1, s2, b2, d, db = p_refs[7 * i: 7 * i + 7]
            bt, h, wc = x_refs[i].shape
            x = x_refs[i][...].reshape(bt * h, wc)
            s = x if pre is None else x + pre                  # sblock residual input

            # S-block: relu(bn1(conv(s))) -> bn2(conv(.)) -> relu(. + s), shared conv weight.
            t = _conv_rows(s, m, bt, h)
            t = jnp.maximum(t * s1[...] + b1[...], 0.0)
            u = _conv_rows(t, m, bt, h)                        # same (shared) weight
            u = u * s2[...] + b2[...]
            out = jnp.maximum(u + s, 0.0)
            o_refs[i][...] = out.reshape(bt, h, wc)

            # Down conv (k=3, stride=2, pad=1, bias) + ReLU, computed only on the
            # even output rows.  Even / odd input rows come from strided reads of
            # the block just stored in VMEM (replaces the old selector matmul).
            even = o_refs[i][:, pl.ds(0, h // 2, stride=2), :]     # rows 0,2,..,h-2
            odd = o_refs[i][:, pl.ds(1, h // 2, stride=2), :]      # rows 1,3,..,h-1
            zero = jnp.zeros((bt, 1, wc), out.dtype)
            odd_prev = jnp.concatenate([zero, odd[:, :-1, :]], axis=1)   # rows -1,1,..,h-3
            lhs = jnp.concatenate([odd_prev, even, odd], axis=-1)
            lhs = lhs.reshape(bt * (h // 2), 3 * wc)
            y = jnp.dot(lhs.astype(PARAM_DTYPE), d[...],
                        preferred_element_type=jnp.float32)
            pre = jnp.maximum(y + db[...], 0.0)                # (bt*(h//2), (w//2)*c_next)

        o_last = o_refs[num_levels]
        o_last[...] = pre.reshape(o_last.shape)

    return kernel


# ----------------------------------------------------------------------------
# Host-side packing: conv weights -> banded matrices (K = 3*W*C), BN fold
# ----------------------------------------------------------------------------
def _conv_to_banded_matrix(w, w_in, stride=1):
    """w: (3, 3, Cin, Cout) -> (3*W_in*Cin, W_out*Cout) banded matrix.

    Row (kh*W_in*Cin + wi*Cin + cin) -> column (wo*Cout + cout) carries tap
    w[kh, kw] for wi = stride*wo + kw - 1 (W-edge zero padding is implicit)."""
    assert w.shape[0] == 3 and w.shape[1] == 3
    cin, cout = int(w.shape[2]), int(w.shape[3])
    w_out = w_in if stride == 1 else w_in // stride
    m = np.zeros((3, w_in * cin, w_out * cout), np.float32)
    w_np = np.asarray(w, np.float32)
    for kh in range(3):
        for wo in range(w_out):
            for kw in range(3):
                wi = stride * wo + kw - 1
                if 0 <= wi < w_in:
                    m[kh, wi * cin:(wi + 1) * cin, wo * cout:(wo + 1) * cout] = w_np[kh, kw]
    return m.reshape(3 * w_in * cin, w_out * cout)


def encoder_init(key, in_channels_ls):
    """Deterministic synthetic parameters (raw form, NHWC / HWIO conventions)."""
    eps = 1e-5
    levels = len(in_channels_ls) - 1
    keys = jax.random.split(key, 3 * levels)
    raw = []
    for i in range(levels):
        c, cn = in_channels_ls[i], in_channels_ls[i + 1]
        kw_, kd, kb = keys[3 * i], keys[3 * i + 1], keys[3 * i + 2]
        w = jax.random.normal(kw_, (3, 3, c, c), jnp.float32) / (3.0 * jnp.sqrt(float(c)))
        idx = jnp.arange(c, dtype=jnp.float32)
        gamma1, beta1 = 1.0 + 0.1 * jnp.cos(idx), 0.05 * jnp.sin(idx)
        mean1, var1 = 0.02 * idx / c, 1.0 + 0.1 * (idx % 3)
        gamma2, beta2 = 1.0 - 0.05 * jnp.sin(idx), 0.03 * jnp.cos(idx)
        mean2, var2 = -0.01 * idx / c, 1.0 + 0.05 * (idx % 4)
        s1 = gamma1 / jnp.sqrt(var1 + eps)
        s2 = gamma2 / jnp.sqrt(var2 + eps)
        dw = jax.random.normal(kd, (3, 3, c, cn), jnp.float32) / (3.0 * jnp.sqrt(float(c)))
        db = 0.1 * jax.random.normal(kb, (cn,), jnp.float32)
        raw.append(dict(w=w, s1=s1, b1=beta1 - mean1 * s1, s2=s2, b2=beta2 - mean2 * s2,
                        dw=dw, db=db))
    return raw


def pack_encoder_params(raw, in_channels_ls, spatials, param_dtype=PARAM_DTYPE):
    """Pack raw params into the lane-dense kernel operands (done once)."""
    levels = len(in_channels_ls) - 1
    packed = []
    for i in range(levels):
        h_sz = w_sz = spatials[i]
        assert h_sz % 2 == 0 and w_sz % 2 == 0, "stride-2 down conv needs even H, W"
        if i + 1 < levels:
            assert spatials[i + 1] * 2 == spatials[i], "pyramid must halve per level"
        c, cn = in_channels_ls[i], in_channels_ls[i + 1]
        rp = raw[i]
        packed.append(dict(
            m=jnp.asarray(_conv_to_banded_matrix(rp["w"], w_sz, stride=1), param_dtype),
            d=jnp.asarray(_conv_to_banded_matrix(rp["dw"], w_sz, stride=2), param_dtype),
            s1=jnp.tile(rp["s1"], w_sz).reshape(1, w_sz * c),
            b1=jnp.tile(rp["b1"], w_sz).reshape(1, w_sz * c),
            s2=jnp.tile(rp["s2"], w_sz).reshape(1, w_sz * c),
            b2=jnp.tile(rp["b2"], w_sz).reshape(1, w_sz * c),
            db=jnp.tile(rp["db"], w_sz // 2).reshape(1, (w_sz // 2) * cn),
            c_out=cn,
        ))
    return packed


# ----------------------------------------------------------------------------
# Fused encoder forward (single pallas_call)
# ----------------------------------------------------------------------------
def encoder_forward(packed, inputs, batch_tile=None):
    """inputs: list of NHWC arrays.  The last one is NOT consumed (matches the
    PyTorch forward, which zips L-1 sblocks with L-1 down convs)."""
    n_lvl = len(inputs) - 1
    n = inputs[0].shape[0]
    if batch_tile is None:
        batch_tile = n // 2 if (n % 2 == 0 and n >= 2) else n   # grid >= 2 -> both v7x cores
    assert n % batch_tile == 0
    grid = (n // batch_tile,)

    shapes = []
    operands = []
    in_specs = []
    for i in range(n_lvl):
        _, h, w, c = inputs[i].shape
        shapes.append((h, w, c))
        operands.append(inputs[i].reshape(n, h, w * c))         # free, contiguity-preserving
        in_specs.append(pl.BlockSpec((batch_tile, h, w * c), lambda b: (b, 0, 0)))

    for i in range(n_lvl):
        p = packed[i]
        lvl_params = [p["m"], p["s1"], p["b1"], p["s2"], p["b2"], p["d"], p["db"]]
        operands += lvl_params
        # Constant index_map: each parameter block is fetched once and stays
        # resident in VMEM across the whole batch grid (no per-step re-DMA).
        in_specs += [pl.BlockSpec(q.shape, lambda b: (0, 0)) for q in lvl_params]

    h_l, w_l, _ = shapes[-1]
    c_l = packed[-1]["c_out"]
    out_shapes = tuple(
        [jax.ShapeDtypeStruct((n, h, w * c), jnp.float32) for (h, w, c) in shapes]
        + [jax.ShapeDtypeStruct((n, h_l // 2, (w_l // 2) * c_l), jnp.float32)])
    out_specs = tuple(pl.BlockSpec((batch_tile,) + s.shape[1:], lambda b: (b, 0, 0))
                      for s in out_shapes)

    # Advisory cost estimate (3 fused MXU matmuls per level) for the XLA scheduler.
    flops = 0
    for i in range(n_lvl):
        h, w, c = shapes[i]
        wc = w * c
        n_dn = int(packed[i]["d"].shape[1])
        flops += 2 * 2 * n * h * (3 * wc) * wc          # two shared-weight 3x3 convs
        flops += 2 * n * (h // 2) * (3 * wc) * n_dn     # stride-2 down conv
    bytes_accessed = int(sum(int(op.nbytes) for op in operands)
                         + sum(int(np.prod(s.shape)) * 4 for s in out_shapes))

    flat_outs = pl.pallas_call(
        _make_encoder_kernel(n_lvl),
        out_shape=out_shapes,
        grid=grid,
        in_specs=in_specs,
        out_specs=out_specs,
        compiler_params=pltpu.CompilerParams(
            dimension_semantics=("parallel",),
            vmem_limit_bytes=32 * 1024 * 1024),
        cost_estimate=pl.CostEstimate(flops=flops, transcendentals=0,
                                      bytes_accessed=bytes_accessed),
    )(*operands)

    outs = [flat_outs[i].reshape(n, shapes[i][0], shapes[i][1], shapes[i][2])
            for i in range(n_lvl)]
    outs.append(flat_outs[-1].reshape(n, h_l // 2, w_l // 2, c_l))
    return outs


# ----------------------------------------------------------------------------
# Pure-XLA reference (NHWC, f32) for a correctness check
# ----------------------------------------------------------------------------
def _conv3x3_nhwc(x, w, stride=1):
    return jax.lax.conv_general_dilated(
        x, w, window_strides=(stride, stride), padding=((1, 1), (1, 1)),
        dimension_numbers=("NHWC", "HWIO", "NHWC"))


def encoder_reference(raw, inputs):
    pre = None
    outs = []
    for i in range(len(inputs) - 1):
        rp = raw[i]
        x = inputs[i]
        s = x if pre is None else x + pre
        t = jnp.maximum(_conv3x3_nhwc(s, rp["w"]) * rp["s1"] + rp["b1"], 0.0)
        u = _conv3x3_nhwc(t, rp["w"]) * rp["s2"] + rp["b2"]
        out = jnp.maximum(u + s, 0.0)
        outs.append(out)
        pre = jnp.maximum(_conv3x3_nhwc(out, rp["dw"], stride=2) + rp["db"], 0.0)
    outs.append(pre)
    return outs


if __name__ == "__main__":
    key = jax.random.PRNGKey(0)
    in_channels_ls = [4, 8, 16]      # feature-pyramid channels (fine -> coarse)
    spatials = [32, 16, 8]           # matching spatial sizes (each level halves)
    N = 8                            # batch; B_TILE = 4 -> grid=(2,), matmul M up to 128

    k_in, k_par = jax.random.split(key)
    in_keys = jax.random.split(k_in, len(in_channels_ls))
    # NHWC inputs (equivalent PyTorch NCHW shapes: (8,4,32,32), (8,8,16,16), (8,16,8,8)).
    # The last pyramid level is unused by Encoder.forward, exactly like the reference module.
    inputs = [jax.random.normal(in_keys[i],
                                (N, spatials[i], spatials[i], in_channels_ls[i]),
                                jnp.float32)
              for i in range(len(in_channels_ls))]

    raw = encoder_init(k_par, in_channels_ls)
    packed = pack_encoder_params(raw, in_channels_ls, spatials)

    outs = encoder_forward(packed, inputs)
    outs = [jax.block_until_ready(o) for o in outs]

    refs = encoder_reference(raw, inputs)
    for o, r in zip(outs, refs):
        assert o.shape == r.shape, (o.shape, r.shape)
        assert bool(jnp.all(jnp.isfinite(o)))
        err = float(jnp.max(jnp.abs(o - r)))
        # bf16 banded weights + bf16 matmul LHS (f32 accumulation) vs. f32 reference;
        # with f32 parameters the same kernel matches to < 2e-3.
        assert err < 6e-2, err
    print("KERNEL_OK")
</pallas_src>

<mosaic_0001>
module attributes {stable_mosaic.version = 11 : i64} {
  func.func @kernel(%arg0: i32, %arg1: memref<4x32x128xf32, #tpu.memory_space<vmem>>, %arg2: memref<4x16x128xf32, #tpu.memory_space<vmem>>, %arg3: memref<384x128xbf16, #tpu.memory_space<vmem>>, %arg4: memref<1x128xf32, #tpu.memory_space<vmem>>, %arg5: memref<1x128xf32, #tpu.memory_space<vmem>>, %arg6: memref<1x128xf32, #tpu.memory_space<vmem>>, %arg7: memref<1x128xf32, #tpu.memory_space<vmem>>, %arg8: memref<384x128xbf16, #tpu.memory_space<vmem>>, %arg9: memref<1x128xf32, #tpu.memory_space<vmem>>, %arg10: memref<384x128xbf16, #tpu.memory_space<vmem>>, %arg11: memref<1x128xf32, #tpu.memory_space<vmem>>, %arg12: memref<1x128xf32, #tpu.memory_space<vmem>>, %arg13: memref<1x128xf32, #tpu.memory_space<vmem>>, %arg14: memref<1x128xf32, #tpu.memory_space<vmem>>, %arg15: memref<384x128xbf16, #tpu.memory_space<vmem>>, %arg16: memref<1x128xf32, #tpu.memory_space<vmem>>, %arg17: memref<4x32x128xf32, #tpu.memory_space<vmem>>, %arg18: memref<4x16x128xf32, #tpu.memory_space<vmem>>, %arg19: memref<4x8x128xf32, #tpu.memory_space<vmem>>) attributes {dimension_semantics = [#tpu.dimension_semantics<parallel>], iteration_bounds = array<i64: 2>, scalar_prefetch = 0 : i64, scratch_operands = 0 : i64, tpu.core_type = #tpu.core_type<tc>, window_params = [{transform_indices = @transform_0, window_bounds = array<i64: 4, 32, 128>}, {transform_indices = @transform_1, window_bounds = array<i64: 4, 16, 128>}, {pipeline_mode = #tpu.pipeline_mode<synchronous>, transform_indices = @transform_2, window_bounds = array<i64: 384, 128>}, {pipeline_mode = #tpu.pipeline_mode<synchronous>, transform_indices = @transform_3, window_bounds = array<i64: 1, 128>}, {pipeline_mode = #tpu.pipeline_mode<synchronous>, transform_indices = @transform_4, window_bounds = array<i64: 1, 128>}, {pipeline_mode = #tpu.pipeline_mode<synchronous>, transform_indices = @transform_5, window_bounds = array<i64: 1, 128>}, {pipeline_mode = #tpu.pipeline_mode<synchronous>, transform_indices = @transform_6, window_bounds = array<i64: 1, 128>}, {pipeline_mode = #tpu.pipeline_mode<synchronous>, transform_indices = @transform_7, window_bounds = array<i64: 384, 128>}, {pipeline_mode = #tpu.pipeline_mode<synchronous>, transform_indices = @transform_8, window_bounds = array<i64: 1, 128>}, {pipeline_mode = #tpu.pipeline_mode<synchronous>, transform_indices = @transform_9, window_bounds = array<i64: 384, 128>}, {pipeline_mode = #tpu.pipeline_mode<synchronous>, transform_indices = @transform_10, window_bounds = array<i64: 1, 128>}, {pipeline_mode = #tpu.pipeline_mode<synchronous>, transform_indices = @transform_11, window_bounds = array<i64: 1, 128>}, {pipeline_mode = #tpu.pipeline_mode<synchronous>, transform_indices = @transform_12, window_bounds = array<i64: 1, 128>}, {pipeline_mode = #tpu.pipeline_mode<synchronous>, transform_indices = @transform_13, window_bounds = array<i64: 1, 128>}, {pipeline_mode = #tpu.pipeline_mode<synchronous>, transform_indices = @transform_14, window_bounds = array<i64: 384, 128>}, {pipeline_mode = #tpu.pipeline_mode<synchronous>, transform_indices = @transform_15, window_bounds = array<i64: 1, 128>}, {transform_indices = @transform_16, window_bounds = array<i64: 4, 32, 128>}, {transform_indices = @transform_17, window_bounds = array<i64: 4, 16, 128>}, {transform_indices = @transform_18, window_bounds = array<i64: 4, 8, 128>}]} {
    %c0 = arith.constant 0 : index
    %c0_0 = arith.constant 0 : index
    %c0_1 = arith.constant 0 : index
    %0 = vector.load %arg1[%c0, %c0_0, %c0_1] : memref<4x32x128xf32, #tpu.memory_space<vmem>>, vector<4x32x128xf32>
    %1 = vector.shape_cast %0 : vector<4x32x128xf32> to vector<128x128xf32>
    %2 = vector.shape_cast %1 : vector<128x128xf32> to vector<4x32x128xf32>
    %cst = arith.constant 0.000000e+00 : f32
    %3 = vector.broadcast %cst : f32 to vector<4x1x128xf32>
    %4 = vector.extract_strided_slice %2 {offsets = [0, 0, 0], sizes = [4, 31, 128], strides = [1, 1, 1]} : vector<4x32x128xf32> to vector<4x31x128xf32>
    %5 = tpu.concatenate %3, %4 in 1 : vector<4x1x128xf32>, vector<4x31x128xf32> -> vector<4x32x128xf32>
    %6 = vector.extract_strided_slice %2 {offsets = [0, 1, 0], sizes = [4, 31, 128], strides = [1, 1, 1]} : vector<4x32x128xf32> to vector<4x31x128xf32>
    %7 = tpu.concatenate %6, %3 in 1 : vector<4x31x128xf32>, vector<4x1x128xf32> -> vector<4x32x128xf32>
    %8 = tpu.concatenate %5, %2, %7 in 2 : vector<4x32x128xf32>, vector<4x32x128xf32>, vector<4x32x128xf32> -> vector<4x32x384xf32>
    %9 = vector.shape_cast %8 : vector<4x32x384xf32> to vector<128x384xf32>
    %10 = arith.truncf %9 : vector<128x384xf32> to vector<128x384xbf16>
    %c0_2 = arith.constant 0 : index
    %c0_3 = arith.constant 0 : index
    %11 = vector.load %arg3[%c0_2, %c0_3] : memref<384x128xbf16, #tpu.memory_space<vmem>>, vector<384x128xbf16>
    %cst_4 = arith.constant dense<0.000000e+00> : vector<128x128xf32>
    %12 = tpu.matmul %10, %11, %cst_4 {dimension_numbers = #tpu.dot_dimension_numbers<[1], [0], [0], [1], [0, 0, 1, 1], [], []>} : vector<128x384xbf16>, vector<384x128xbf16>, vector<128x128xf32> -> vector<128x128xf32>
    %c0_5 = arith.constant 0 : index
    %c0_6 = arith.constant 0 : index
    %13 = vector.load %arg4[%c0_5, %c0_6] : memref<1x128xf32, #tpu.memory_space<vmem>>, vector<1x128xf32>
    %14 = vector.broadcast %13 : vector<1x128xf32> to vector<128x128xf32>
    %15 = arith.mulf %12, %14 : vector<128x128xf32>
    %c0_7 = arith.constant 0 : index
    %c0_8 = arith.constant 0 : index
    %16 = vector.load %arg5[%c0_7, %c0_8] : memref<1x128xf32, #tpu.memory_space<vmem>>, vector<1x128xf32>
    %17 = vector.broadcast %16 : vector<1x128xf32> to vector<128x128xf32>
    %18 = arith.addf %15, %17 : vector<128x128xf32>
    %cst_9 = arith.constant 0.000000e+00 : f32
    %19 = vector.broadcast %cst_9 : f32 to vector<128x128xf32>
    %20 = arith.maximumf %18, %19 : vector<128x128xf32>
    %21 = vector.shape_cast %20 : vector<128x128xf32> to vector<4x32x128xf32>
    %cst_10 = arith.constant 0.000000e+00 : f32
    %22 = vector.broadcast %cst_10 : f32 to vector<4x1x128xf32>
    %23 = vector.extract_strided_slice %21 {offsets = [0, 0, 0], sizes = [4, 31, 128], strides = [1, 1, 1]} : vector<4x32x128xf32> to vector<4x31x128xf32>
    %24 = tpu.concatenate %22, %23 in 1 : vector<4x1x128xf32>, vector<4x31x128xf32> -> vector<4x32x128xf32>
    %25 = vector.extract_strided_slice %21 {offsets = [0, 1, 0], sizes = [4, 31, 128], strides = [1, 1, 1]} : vector<4x32x128xf32> to vector<4x31x128xf32>
    %26 = tpu.concatenate %25, %22 in 1 : vector<4x31x128xf32>, vector<4x1x128xf32> -> vector<4x32x128xf32>
    %27 = tpu.concatenate %24, %21, %26 in 2 : vector<4x32x128xf32>, vector<4x32x128xf32>, vector<4x32x128xf32> -> vector<4x32x384xf32>
    %28 = vector.shape_cast %27 : vector<4x32x384xf32> to vector<128x384xf32>
    %29 = arith.truncf %28 : vector<128x384xf32> to vector<128x384xbf16>
    %c0_11 = arith.constant 0 : index
    %c0_12 = arith.constant 0 : index
    %30 = vector.load %arg3[%c0_11, %c0_12] : memref<384x128xbf16, #tpu.memory_space<vmem>>, vector<384x128xbf16>
    %cst_13 = arith.constant dense<0.000000e+00> : vector<128x128xf32>
    %31 = tpu.matmul %29, %30, %cst_13 {dimension_numbers = #tpu.dot_dimension_numbers<[1], [0], [0], [1], [0, 0, 1, 1], [], []>} : vector<128x384xbf16>, vector<384x128xbf16>, vector<128x128xf32> -> vector<128x128xf32>
    %c0_14 = arith.constant 0 : index
    %c0_15 = arith.constant 0 : index
    %32 = vector.load %arg6[%c0_14, %c0_15] : memref<1x128xf32, #tpu.memory_space<vmem>>, vector<1x128xf32>
    %33 = vector.broadcast %32 : vector<1x128xf32> to vector<128x128xf32>
    %34 = arith.mulf %31, %33 : vector<128x128xf32>
    %c0_16 = arith.constant 0 : index
    %c0_17 = arith.constant 0 : index
    %35 = vector.load %arg7[%c0_16, %c0_17] : memref<1x128xf32, #tpu.memory_space<vmem>>, vector<1x128xf32>
    %36 = vector.broadcast %35 : vector<1x128xf32> to vector<128x128xf32>
    %37 = arith.addf %34, %36 : vector<128x128xf32>
    %38 = arith.addf %37, %1 : vector<128x128xf32>
    %cst_18 = arith.constant 0.000000e+00 : f32
    %39 = vector.broadcast %cst_18 : f32 to vector<128x128xf32>
    %40 = arith.maximumf %38, %39 : vector<128x128xf32>
    %41 = vector.shape_cast %40 : vector<128x128xf32> to vector<4x32x128xf32>
    %c0_19 = arith.constant 0 : index
    %c0_20 = arith.constant 0 : index
    %c0_21 = arith.constant 0 : index
    %42 = vector.load %arg17[%c0_19, %c0_20, %c0_21] : memref<4x32x128xf32, #tpu.memory_space<vmem>>, vector<4x32x128xf32>
    tpu.vector_store %arg17[%c0_19, %c0_20, %c0_21], %41 {strides = array<i32>} : memref<4x32x128xf32, #tpu.memory_space<vmem>>, vector<4x32x128xf32>,
    %c0_22 = arith.constant 0 : index
    %c0_23 = arith.constant 0 : index
    %c0_24 = arith.constant 0 : index
    %43 = tpu.strided_load %arg17[%c0_22, %c0_23, %c0_24] {strides = array<i32: 1, 2, 1>} : memref<4x32x128xf32, #tpu.memory_space<vmem>>, vector<4x16x128xf32>
    %c0_25 = arith.constant 0 : index
    %c1 = arith.constant 1 : index
    %c0_26 = arith.constant 0 : index
    %44 = tpu.strided_load %arg17[%c0_25, %c1, %c0_26] {strides = array<i32: 1, 2, 1>} : memref<4x32x128xf32, #tpu.memory_space<vmem>>, vector<4x16x128xf32>
    %cst_27 = arith.constant 0.000000e+00 : f32
    %45 = vector.broadcast %cst_27 : f32 to vector<4x1x128xf32>
    %46 = vector.extract_strided_slice %44 {offsets = [0, 0, 0], sizes = [4, 15, 128], strides = [1, 1, 1]} : vector<4x16x128xf32> to vector<4x15x128xf32>
    %47 = tpu.concatenate %45, %46 in 1 : vector<4x1x128xf32>, vector<4x15x128xf32> -> vector<4x16x128xf32>
    %48 = tpu.concatenate %47, %43, %44 in 2 : vector<4x16x128xf32>, vector<4x16x128xf32>, vector<4x16x128xf32> -> vector<4x16x384xf32>
    %49 = vector.shape_cast %48 : vector<4x16x384xf32> to vector<64x384xf32>
    %50 = arith.truncf %49 : vector<64x384xf32> to vector<64x384xbf16>
    %c0_28 = arith.constant 0 : index
    %c0_29 = arith.constant 0 : index
    %51 = vector.load %arg8[%c0_28, %c0_29] : memref<384x128xbf16, #tpu.memory_space<vmem>>, vector<384x128xbf16>
    %cst_30 = arith.constant dense<0.000000e+00> : vector<64x128xf32>
    %52 = tpu.matmul %50, %51, %cst_30 {dimension_numbers = #tpu.dot_dimension_numbers<[1], [0], [0], [1], [0, 0, 1, 1], [], []>} : vector<64x384xbf16>, vector<384x128xbf16>, vector<64x128xf32> -> vector<64x128xf32>
    %c0_31 = arith.constant 0 : index
    %c0_32 = arith.constant 0 : index
    %53 = vector.load %arg9[%c0_31, %c0_32] : memref<1x128xf32, #tpu.memory_space<vmem>>, vector<1x128xf32>
    %54 = vector.broadcast %53 : vector<1x128xf32> to vector<64x128xf32>
    %55 = arith.addf %52, %54 : vector<64x128xf32>
    %cst_33 = arith.constant 0.000000e+00 : f32
    %56 = vector.broadcast %cst_33 : f32 to vector<64x128xf32>
    %57 = arith.maximumf %55, %56 : vector<64x128xf32>
    %c0_34 = arith.constant 0 : index
    %c0_35 = arith.constant 0 : index
    %c0_36 = arith.constant 0 : index
    %58 = vector.load %arg2[%c0_34, %c0_35, %c0_36] : memref<4x16x128xf32, #tpu.memory_space<vmem>>, vector<4x16x128xf32>
    %59 = vector.shape_cast %58 : vector<4x16x128xf32> to vector<64x128xf32>
    %60 = arith.addf %59, %57 : vector<64x128xf32>
    %61 = vector.shape_cast %60 : vector<64x128xf32> to vector<4x16x128xf32>
    %cst_37 = arith.constant 0.000000e+00 : f32
    %62 = vector.broadcast %cst_37 : f32 to vector<4x1x128xf32>
    %63 = vector.extract_strided_slice %61 {offsets = [0, 0, 0], sizes = [4, 15, 128], strides = [1, 1, 1]} : vector<4x16x128xf32> to vector<4x15x128xf32>
    %64 = tpu.concatenate %62, %63 in 1 : vector<4x1x128xf32>, vector<4x15x128xf32> -> vector<4x16x128xf32>
    %65 = vector.extract_strided_slice %61 {offsets = [0, 1, 0], sizes = [4, 15, 128], strides = [1, 1, 1]} : vector<4x16x128xf32> to vector<4x15x128xf32>
    %66 = tpu.concatenate %65, %62 in 1 : vector<4x15x128xf32>, vector<4x1x128xf32> -> vector<4x16x128xf32>
    %67 = tpu.concatenate %64, %61, %66 in 2 : vector<4x16x128xf32>, vector<4x16x128xf32>, vector<4x16x128xf32> -> vector<4x16x384xf32>
    %68 = vector.shape_cast %67 : vector<4x16x384xf32> to vector<64x384xf32>
    %69 = arith.truncf %68 : vector<64x384xf32> to vector<64x384xbf16>
    %c0_38 = arith.constant 0 : index
    %c0_39 = arith.constant 0 : index
    %70 = vector.load %arg10[%c0_38, %c0_39] : memref<384x128xbf16, #tpu.memory_space<vmem>>, vector<384x128xbf16>
    %cst_40 = arith.constant dense<0.000000e+00> : vector<64x128xf32>
    %71 = tpu.matmul %69, %70, %cst_40 {dimension_numbers = #tpu.dot_dimension_numbers<[1], [0], [0], [1], [0, 0, 1, 1], [], []>} : vector<64x384xbf16>, vector<384x128xbf16>, vector<64x128xf32> -> vector<64x128xf32>
    %c0_41 = arith.constant 0 : index
    %c0_42 = arith.constant 0 : index
    %72 = vector.load %arg11[%c0_41, %c0_42] : memref<1x128xf32, #tpu.memory_space<vmem>>, vector<1x128xf32>
    %73 = vector.broadcast %72 : vector<1x128xf32> to vector<64x128xf32>
    %74 = arith.mulf %71, %73 : vector<64x128xf32>
    %c0_43 = arith.constant 0 : index
    %c0_44 = arith.constant 0 : index
    %75 = vector.load %arg12[%c0_43, %c0_44] : memref<1x128xf32, #tpu.memory_space<vmem>>, vector<1x128xf32>
    %76 = vector.broadcast %75 : vector<1x128xf32> to vector<64x128xf32>
    %77 = arith.addf %74, %76 : vector<64x128xf32>
    %cst_45 = arith.constant 0.000000e+00 : f32
    %78 = vector.broadcast %cst_45 : f32 to vector<64x128xf32>
    %79 = arith.maximumf %77, %78 : vector<64x128xf32>
    %80 = vector.shape_cast %79 : vector<64x128xf32> to vector<4x16x128xf32>
    %cst_46 = arith.constant 0.000000e+00 : f32
    %81 = vector.broadcast %cst_46 : f32 to vector<4x1x128xf32>
    %82 = vector.extract_strided_slice %80 {offsets = [0, 0, 0], sizes = [4, 15, 128], strides = [1, 1, 1]} : vector<4x16x128xf32> to vector<4x15x128xf32>
    %83 = tpu.concatenate %81, %82 in 1 : vector<4x1x128xf32>, vector<4x15x128xf32> -> vector<4x16x128xf32>
    %84 = vector.extract_strided_slice %80 {offsets = [0, 1, 0], sizes = [4, 15, 128], strides = [1, 1, 1]} : vector<4x16x128xf32> to vector<4x15x128xf32>
    %85 = tpu.concatenate %84, %81 in 1 : vector<4x15x128xf32>, vector<4x1x128xf32> -> vector<4x16x128xf32>
    %86 = tpu.concatenate %83, %80, %85 in 2 : vector<4x16x128xf32>, vector<4x16x128xf32>, vector<4x16x128xf32> -> vector<4x16x384xf32>
    %87 = vector.shape_cast %86 : vector<4x16x384xf32> to vector<64x384xf32>
    %88 = arith.truncf %87 : vector<64x384xf32> to vector<64x384xbf16>
    %c0_47 = arith.constant 0 : index
    %c0_48 = arith.constant 0 : index
    %89 = vector.load %arg10[%c0_47, %c0_48] : memref<384x128xbf16, #tpu.memory_space<vmem>>, vector<384x128xbf16>
    %cst_49 = arith.constant dense<0.000000e+00> : vector<64x128xf32>
    %90 = tpu.matmul %88, %89, %cst_49 {dimension_numbers = #tpu.dot_dimension_numbers<[1], [0], [0], [1], [0, 0, 1, 1], [], []>} : vector<64x384xbf16>, vector<384x128xbf16>, vector<64x128xf32> -> vector<64x128xf32>
    %c0_50 = arith.constant 0 : index
    %c0_51 = arith.constant 0 : index
    %91 = vector.load %arg13[%c0_50, %c0_51] : memref<1x128xf32, #tpu.memory_space<vmem>>, vector<1x128xf32>
    %92 = vector.broadcast %91 : vector<1x128xf32> to vector<64x128xf32>
    %93 = arith.mulf %90, %92 : vector<64x128xf32>
    %c0_52 = arith.constant 0 : index
    %c0_53 = arith.constant 0 : index
    %94 = vector.load %arg14[%c0_52, %c0_53] : memref<1x128xf32, #tpu.memory_space<vmem>>, vector<1x128xf32>
    %95 = vector.broadcast %94 : vector<1x128xf32> to vector<64x128xf32>
    %96 = arith.addf %93, %95 : vector<64x128xf32>
    %97 = arith.addf %96, %60 : vector<64x128xf32>
    %cst_54 = arith.constant 0.000000e+00 : f32
    %98 = vector.broadcast %cst_54 : f32 to vector<64x128xf32>
    %99 = arith.maximumf %97, %98 : vector<64x128xf32>
    %100 = vector.shape_cast %99 : vector<64x128xf32> to vector<4x16x128xf32>
    %c0_55 = arith.constant 0 : index
    %c0_56 = arith.constant 0 : index
    %c0_57 = arith.constant 0 : index
    %101 = vector.load %arg18[%c0_55, %c0_56, %c0_57] : memref<4x16x128xf32, #tpu.memory_space<vmem>>, vector<4x16x128xf32>
    tpu.vector_store %arg18[%c0_55, %c0_56, %c0_57], %100 {strides = array<i32>} : memref<4x16x128xf32, #tpu.memory_space<vmem>>, vector<4x16x128xf32>,
    %c0_58 = arith.constant 0 : index
    %c0_59 = arith.constant 0 : index
    %c0_60 = arith.constant 0 : index
    %102 = tpu.strided_load %arg18[%c0_58, %c0_59, %c0_60] {strides = array<i32: 1, 2, 1>} : memref<4x16x128xf32, #tpu.memory_space<vmem>>, vector<4x8x128xf32>
    %c0_61 = arith.constant 0 : index
    %c1_62 = arith.constant 1 : index
    %c0_63 = arith.constant 0 : index
    %103 = tpu.strided_load %arg18[%c0_61, %c1_62, %c0_63] {strides = array<i32: 1, 2, 1>} : memref<4x16x128xf32, #tpu.memory_space<vmem>>, vector<4x8x128xf32>
    %cst_64 = arith.constant 0.000000e+00 : f32
    %104 = vector.broadcast %cst_64 : f32 to vector<4x1x128xf32>
    %105 = vector.extract_strided_slice %103 {offsets = [0, 0, 0], sizes = [4, 7, 128], strides = [1, 1, 1]} : vector<4x8x128xf32> to vector<4x7x128xf32>
    %106 = tpu.concatenate %104, %105 in 1 : vector<4x1x128xf32>, vector<4x7x128xf32> -> vector<4x8x128xf32>
    %107 = tpu.concatenate %106, %102, %103 in 2 : vector<4x8x128xf32>, vector<4x8x128xf32>, vector<4x8x128xf32> -> vector<4x8x384xf32>
    %108 = vector.shape_cast %107 : vector<4x8x384xf32> to vector<32x384xf32>
    %109 = arith.truncf %108 : vector<32x384xf32> to vector<32x384xbf16>
    %c0_65 = arith.constant 0 : index
    %c0_66 = arith.constant 0 : index
    %110 = vector.load %arg15[%c0_65, %c0_66] : memref<384x128xbf16, #tpu.memory_space<vmem>>, vector<384x128xbf16>
    %cst_67 = arith.constant dense<0.000000e+00> : vector<32x128xf32>
    %111 = tpu.matmul %109, %110, %cst_67 {dimension_numbers = #tpu.dot_dimension_numbers<[1], [0], [0], [1], [0, 0, 1, 1], [], []>} : vector<32x384xbf16>, vector<384x128xbf16>, vector<32x128xf32> -> vector<32x128xf32>
    %c0_68 = arith.constant 0 : index
    %c0_69 = arith.constant 0 : index
    %112 = vector.load %arg16[%c0_68, %c0_69] : memref<1x128xf32, #tpu.memory_space<vmem>>, vector<1x128xf32>
    %113 = vector.broadcast %112 : vector<1x128xf32> to vector<32x128xf32>
    %114 = arith.addf %111, %113 : vector<32x128xf32>
    %cst_70 = arith.constant 0.000000e+00 : f32
    %115 = vector.broadcast %cst_70 : f32 to vector<32x128xf32>
    %116 = arith.maximumf %114, %115 : vector<32x128xf32>
    %117 = vector.shape_cast %116 : vector<32x128xf32> to vector<4x8x128xf32>
    %c0_71 = arith.constant 0 : index
    %c0_72 = arith.constant 0 : index
    %c0_73 = arith.constant 0 : index
    %118 = vector.load %arg19[%c0_71, %c0_72, %c0_73] : memref<4x8x128xf32, #tpu.memory_space<vmem>>, vector<4x8x128xf32>
    tpu.vector_store %arg19[%c0_71, %c0_72, %c0_73], %117 {strides = array<i32>} : memref<4x8x128xf32, #tpu.memory_space<vmem>>, vector<4x8x128xf32>,
    return
  }
  func.func @transform_0(%arg0: i32) -> (i32, i32, i32) {
    %c0_i32 = arith.constant 0 : i32
    %c0_i32_0 = arith.constant 0 : i32
    %c0_i32_1 = arith.constant 0 : i32
    return %arg0, %c0_i32, %c0_i32_0 : i32, i32, i32
  }
  func.func @transform_1(%arg0: i32) -> (i32, i32, i32) {
    %c0_i32 = arith.constant 0 : i32
    %c0_i32_0 = arith.constant 0 : i32
    %c0_i32_1 = arith.constant 0 : i32
    return %arg0, %c0_i32, %c0_i32_0 : i32, i32, i32
  }
  func.func @transform_2(%arg0: i32) -> (i32, i32) {
    %c0_i32 = arith.constant 0 : i32
    %c0_i32_0 = arith.constant 0 : i32
    %c0_i32_1 = arith.constant 0 : i32
    return %c0_i32, %c0_i32_0 : i32, i32
  }
  func.func @transform_3(%arg0: i32) -> (i32, i32) {
    %c0_i32 = arith.constant 0 : i32
    %c0_i32_0 = arith.constant 0 : i32
    %c0_i32_1 = arith.constant 0 : i32
    return %c0_i32, %c0_i32_0 : i32, i32
  }
  func.func @transform_4(%arg0: i32) -> (i32, i32) {
    %c0_i32 = arith.constant 0 : i32
    %c0_i32_0 = arith.constant 0 : i32
    %c0_i32_1 = arith.constant 0 : i32
    return %c0_i32, %c0_i32_0 : i32, i32
  }
  func.func @transform_5(%arg0: i32) -> (i32, i32) {
    %c0_i32 = arith.constant 0 : i32
    %c0_i32_0 = arith.constant 0 : i32
    %c0_i32_1 = arith.constant 0 : i32
    return %c0_i32, %c0_i32_0 : i32, i32
  }
  func.func @transform_6(%arg0: i32) -> (i32, i32) {
    %c0_i32 = arith.constant 0 : i32
    %c0_i32_0 = arith.constant 0 : i32
    %c0_i32_1 = arith.constant 0 : i32
    return %c0_i32, %c0_i32_0 : i32, i32
  }
  func.func @transform_7(%arg0: i32) -> (i32, i32) {
    %c0_i32 = arith.constant 0 : i32
    %c0_i32_0 = arith.constant 0 : i32
    %c0_i32_1 = arith.constant 0 : i32
    return %c0_i32, %c0_i32_0 : i32, i32
  }
  func.func @transform_8(%arg0: i32) -> (i32, i32) {
    %c0_i32 = arith.constant 0 : i32
    %c0_i32_0 = arith.constant 0 : i32
    %c0_i32_1 = arith.constant 0 : i32
    return %c0_i32, %c0_i32_0 : i32, i32
  }
  func.func @transform_9(%arg0: i32) -> (i32, i32) {
    %c0_i32 = arith.constant 0 : i32
    %c0_i32_0 = arith.constant 0 : i32
    %c0_i32_1 = arith.constant 0 : i32
    return %c0_i32, %c0_i32_0 : i32, i32
  }
  func.func @transform_10(%arg0: i32) -> (i32, i32) {
    %c0_i32 = arith.constant 0 : i32
    %c0_i32_0 = arith.constant 0 : i32
    %c0_i32_1 = arith.constant 0 : i32
    return %c0_i32, %c0_i32_0 : i32, i32
  }
  func.func @transform_11(%arg0: i32) -> (i32, i32) {
    %c0_i32 = arith.constant 0 : i32
    %c0_i32_0 = arith.constant 0 : i32
    %c0_i32_1 = arith.constant 0 : i32
    return %c0_i32, %c0_i32_0 : i32, i32
  }
  func.func @transform_12(%arg0: i32) -> (i32, i32) {
    %c0_i32 = arith.constant 0 : i32
    %c0_i32_0 = arith.constant 0 : i32
    %c0_i32_1 = arith.constant 0 : i32
    return %c0_i32, %c0_i32_0 : i32, i32
  }
  func.func @transform_13(%arg0: i32) -> (i32, i32) {
    %c0_i32 = arith.constant 0 : i32
    %c0_i32_0 = arith.constant 0 : i32
    %c0_i32_1 = arith.constant 0 : i32
    return %c0_i32, %c0_i32_0 : i32, i32
  }
  func.func @transform_14(%arg0: i32) -> (i32, i32) {
    %c0_i32 = arith.constant 0 : i32
    %c0_i32_0 = arith.constant 0 : i32
    %c0_i32_1 = arith.constant 0 : i32
    return %c0_i32, %c0_i32_0 : i32, i32
  }
  func.func @transform_15(%arg0: i32) -> (i32, i32) {
    %c0_i32 = arith.constant 0 : i32
    %c0_i32_0 = arith.constant 0 : i32
    %c0_i32_1 = arith.constant 0 : i32
    return %c0_i32, %c0_i32_0 : i32, i32
  }
  func.func @transform_16(%arg0: i32) -> (i32, i32, i32) {
    %c0_i32 = arith.constant 0 : i32
    %c0_i32_0 = arith.constant 0 : i32
    %c0_i32_1 = arith.constant 0 : i32
    return %arg0, %c0_i32, %c0_i32_0 : i32, i32, i32
  }
  func.func @transform_17(%arg0: i32) -> (i32, i32, i32) {
    %c0_i32 = arith.constant 0 : i32
    %c0_i32_0 = arith.constant 0 : i32
    %c0_i32_1 = arith.constant 0 : i32
    return %arg0, %c0_i32, %c0_i32_0 : i32, i32, i32
  }
  func.func @transform_18(%arg0: i32) -> (i32, i32, i32) {
    %c0_i32 = arith.constant 0 : i32
    %c0_i32_0 = arith.constant 0 : i32
    %c0_i32_1 = arith.constant 0 : i32
    return %arg0, %c0_i32, %c0_i32_0 : i32, i32, i32
  }
}

</mosaic_0001>

<bundles_post_ra>
// kernel: tpu_custom_call.1
= control target key start
LH: loop header
LB: loop body
LE: loop exit
PB: predicated region body
PF: predicated region fallthrough
CT: control target
= control target key end

     0   :  { %s5334_s0 = inlined_call_operand.hbm [shape: f32[8,32,128], index: 0, kind: input, shape index: {}]   ;;  %s5335_s1 = inlined_call_operand.hbm [shape: f32[8,16,128], index: 1, kind: input, shape index: {}]   ;;  %s5336_s2 = inlined_call_operand.hbm [shape: bf16[384,128], index: 2, kind: input, shape index: {}]   ;;  %s5337_s3 = inlined_call_operand.vmem [shape: f32[1,128], index: 3, kind: input, shape index: {}]   ;;  %s5338_s4 = inlined_call_operand.vmem [shape: f32[1,128], index: 4, kind: input, shape index: {}]   ;;  %s5339_s5 = inlined_call_operand.vmem [shape: f32[1,128], index: 5, kind: input, shape index: {}]   ;;  %s5340_s6 = inlined_call_operand.vmem [shape: f32[1,128], index: 6, kind: input, shape index: {}]   ;;  %s5341_s7 = inlined_call_operand.hbm [shape: bf16[384,128], index: 7, kind: input, shape index: {}]   ;;  %s5342_s8 = inlined_call_operand.vmem [shape: f32[1,128], index: 8, kind: input, shape index: {}]   ;;  %s5343_s9 = inlined_call_operand.hbm [shape: bf16[384,128], index: 9, kind: input, shape index: {}]   ;;  %s5344_s10 = inlined_call_operand.vmem [shape: f32[1,128], index: 10, kind: input, shape index: {}]   ;;  %s5345_s11 = inlined_call_operand.vmem [shape: f32[1,128], index: 11, kind: input, shape index: {}]   ;;  %s5346_s12 = inlined_call_operand.vmem [shape: f32[1,128], index: 12, kind: input, shape index: {}]   ;;  %s5347_s13 = inlined_call_operand.vmem [shape: f32[1,128], index: 13, kind: input, shape index: {}]   ;;  %s5348_s14 = inlined_call_operand.hbm [shape: bf16[384,128], index: 14, kind: input, shape index: {}]   ;;  %s5349_s15 = inlined_call_operand.vmem [shape: f32[1,128], index: 15, kind: input, shape index: {}]   ;;  %s5350_s16 = inlined_call_operand.hbm [shape: f32[8,32,128], index: 16, kind: output, shape index: {0}]   ;;  %s5351_s17 = inlined_call_operand.hbm [shape: f32[8,16,128], index: 17, kind: output, shape index: {1}]   ;;  %s5352_s18 = inlined_call_operand.hbm [shape: f32[8,8,128], index: 18, kind: output, shape index: {2}]  }
   0x1   :  { %5369 = sst [smem:[#allocation30_spill]] %s5334_s0 }
   0x2   :  { %5370 = sst [smem:[#allocation31_spill]] %s5335_s1 }
   0x3   :  { %5371 = sst [smem:[#allocation32_spill]] %s5336_s2 }
   0x4   :  { %5372 = sst [smem:[#allocation33_spill]] %s5341_s7 }
   0x5   :  { %5373 = sst [smem:[#allocation34_spill]] %s5343_s9 }
   0x6   :  { %5374 = sst [smem:[#allocation35_spill]] %s5345_s11 }
   0x7   :  { %5375 = sst [smem:[#allocation36_spill]] %s5346_s12 }
   0x8   :  { %5376 = sst [smem:[#allocation37_spill]] %s5347_s13 }
   0x9   :  { %5377 = sst [smem:[#allocation38_spill]] %s5348_s14 }
   0xa   :  { %5378 = sst [smem:[#allocation39_spill]] %s5349_s15 }
   0xb   :  { %5379 = sst [smem:[#allocation40_spill]] %s5350_s16 }
   0xc   :  { %5380 = sst [smem:[#allocation41_spill]] %s5351_s17 }
   0xd   :  { %5381 = sst [smem:[#allocation42_spill]] %s5352_s18 }
   0xe   :  { %24 = vsyncpa [#allocation3], 0 }
   0xf   :  { %26 = vsyncpa [#allocation3 + $0x1], 0 }
  0x10   :  { %27 = vsyncpa [#allocation6], 0 }
  0x11   :  { %29 = vsyncpa [#allocation6 + $0x1], 0 }
  0x12   :  { %30 = vsyncpa [#allocation9], 0 }
  0x13   :  { %31 = vsyncpa [#allocation12], 0 }
  0x14   :  { %32 = vsyncpa [#allocation4], 0 }
  0x15   :  { %34 = vsyncpa [#allocation4 + $0x1], 0 }
  0x16   :  { %35 = vsyncpa [#allocation15], 0 }
  0x17   :  { %37 = vsyncpa [#allocation15 + $0x1], 0  ;;  %s4406_s27 = smov 0   ;;  %s4408_s28 = smov 0  }
  0x18   :  { %s4410_s29 = smov 0   ;;  %s4412_s30 = smov 0  }
  0x19 LB: > { %5382 = sst [smem:[#allocation24_spill]] %s4286_s27  ;;  %s4427_s0 = sadd.s32 4294967295, %s4298_s30   ;;  %s4298_s30 = sphi %s4412_s30, %s5419_s30   ;;  %s4294_s29 = sphi %s4410_s29, %s5421_s29   ;;  %s4290_s28 = sphi %s4408_s28, %s5423_s28   ;;  %s4286_s27 = sphi %s4406_s27, %s5422_s27  }
  0x1a   : > { %5383 = sst [smem:[#allocation25_spill]] %s4294_s29  ;;  %s5355_s19 = sadd.s32 4294967294, %s4298_s30  }
  0x1b   : > { %p63_p0 = scmp.ne.s32.totalorder %s4290_s28, %s4286_s27  ;;  %p64_p1 = scmp.eq.s32.totalorder %s4427_s0, 0 }
  0x1c   : > { %p407_p2 = scmp.eq.s32.totalorder %s4427_s0, 1  ;;  %p413_p3 = scmp.eq.s32.totalorder %s5355_s19, 1 }
  0x1d   : > { %p4438_p4 = por %p64_p1, %p63_p0  ;;  %p3171_p5 = scmp.ge.s32.totalorder %s4298_s30, 1 }
  0x1e   : > { %p4443_p6 = por %p413_p3, %p63_p0  ;;  %p472_p7 = scmp.lt.s32.totalorder %s4298_s30, 3 }
  0x1f   : > { %s5387_s2 = sld [smem:[#allocation32_spill]]  ;;  %s4300_s25 = smov [#allocation7]  }
  0x20   : > { %s5385_s20 = scalar_select %p4443_p6, 1, 0 }
  0x21   : > { %p4451_p8 = pnand %p3171_p5, %p472_p7  ;;  %s485_s26 = sshll.u32 %s4300_s25, 4  ;;  %s486_s26 = int_to_ptr.vmem [resolvable:$true] %s485_s26 }
  0x22   : > { %5386 = sst [smem:[#allocation26_spill]] %s5385_s20  ;;  %s4301_s20 = smov 64  }
  0x23   : > { %p3883_p9 = pneg %p4451_p8  ;;  %s5390_s7 = sld [smem:[#allocation33_spill]] }
  0x24   : > { %s4302_s27 = smov 4   ;;  %s4303_s25 = smov [#allocation8]  }
  0x25   : > { %s483_s23 = sshll.u32 %s5387_s2, 4  ;;  %p4459_p10 = pnand %p3883_p9, %p64_p1  ;;  %s484_s23 = int_to_ptr.hbm [resolvable:$true] %s483_s23 }
  0x26   : > { %s511_s18 = sshll.u32 %s4303_s25, 4  ;;  %s5391_s9 = sld [smem:[#allocation34_spill]]  ;;  %s512_s18 = int_to_ptr.vmem [resolvable:$true] %s511_s18 }
  0x27   : > { %3886 = dma.hbm_to_vmem [thread:$0]  (!%p4459_p10), %s484_s23, 3072, %s486_s26, [#allocation6], %s4301_s20, %s4301_s20, %s4302_s27  }
  0x28   : > { %s5392_s14 = sld [smem:[#allocation38_spill]]  ;;  %s4304_s26 = smov [#allocation10]  }
  0x29   : > { %s509_s2 = sshll.u32 %s5390_s7, 4  ;;  %s528_s25 = sshll.u32 %s4304_s26, 4  ;;  %s510_s2 = int_to_ptr.hbm [resolvable:$true] %s509_s2  ;;  %s529_s25 = int_to_ptr.vmem [resolvable:$true] %s528_s25 }
  0x2a   : > { %3889 = dma.hbm_to_vmem [thread:$0]  (!%p4459_p10), %s510_s2, 3072, %s512_s18, [#allocation9], %s4301_s20, %s4301_s20, %s4302_s27  }
  0x2b   : > { %s4305_s15 = smov [#allocation11]   ;;  %s4482_s18 = sadd.s32 1, %s4298_s30  }
  0x2c   : > { %s526_s17 = sshll.u32 %s5391_s9, 4  ;;  %s554_s16 = sshll.u32 %s4305_s15, 4  ;;  %s527_s17 = int_to_ptr.hbm [resolvable:$true] %s526_s17  ;;  %s555_s16 = int_to_ptr.vmem [resolvable:$true] %s554_s16 }
  0x2d   : > { %3892 = dma.hbm_to_vmem [thread:$0]  (!%p4459_p10), %s527_s17, 3072, %s529_s25, [#allocation9], %s4301_s20, %s4301_s20, %s4302_s27  }
  0x2e   : > { %s552_s23 = sshll.u32 %s5392_s14, 4  ;;  %5393 = sst [smem:[#allocation27_spill]] %s4482_s18  ;;  %s553_s23 = int_to_ptr.hbm [resolvable:$true] %s552_s23 }
  0x2f   : > { %3895 = dma.hbm_to_vmem [thread:$0]  (!%p4459_p10), %s553_s23, 3072, %s555_s16, [#allocation12], %s4301_s20, %s4301_s20, %s4302_s27  }
  0x30   : > { %s50_s2 = sadd.s32 1, %s4294_s29  ;;  %s47_s21 = ssub.s32 %s4298_s30, %s4482_s18 }
  0x31   : > { %p57_p12 = scmp.ne.s32.totalorder %s4294_s29, %s4290_s28  ;;  %p48_p13 = scmp.eq.s32.totalorder %s47_s21, 0 }
  0x32   : > { %p58_p0 = scmp.eq.s32.totalorder %s4298_s30, 0  ;;  %p3917_p5 = scmp.lt.s32.totalorder %s4298_s30, 2 }
  0x33   : > { %p4492_p3 = por %p407_p2, %p57_p12  ;;  %s4501_s19 = sand.u32 1, %s4294_s29  }
  0x34   : > { %s4498_s17 = scalar_select %p48_p13, %s4294_s29, %s50_s2  }
  0x35   : > { %s5394_s22 = scalar_select %p4492_p3, 1, 0 }
  0x36   : > { %5396 = sst [smem:[#allocation29_spill]] %s4498_s17  ;;  %p59_p7 = por %p58_p0, %p57_p12 }
  0x37   : > { %5395 = sst [smem:[#allocation28_spill]] %s5394_s22  ;;  %s3177_s27 = sshll.u32 %s4501_s19, 7 }
  0x38   : > { %s3753_s20 = sshll.u32 %s4298_s30, 7  ;;  %s5397_s25 = sld [smem:[#allocation30_spill]] }
  0x39   : > { %s575_s16 = scalar_lea.vmem [#allocation2], %s3177_s27  ;;  %p4508_p2 = pnand %p3917_p5, %p59_p7 }
  0x3a   : > { %s584_s21 = sshll.u32 %s575_s16, 4  ;;  %s594_s2 = sand.u32 1, %s4298_s30   ;;  %s585_s21 = int_to_ptr.vmem [resolvable:$true] %s584_s21 }
  0x3b   : > { %s572_s14 = scalar_lea.sflag [#allocation3], %s4501_s19  ;;  %p4100_p10 = pneg %p4508_p2 }
  0x3e   : > { %s581_s15 = scalar_lea.hbm %s5397_s25, %s3753_s20  ;;  %s4103_s23 = scalar_lea.hbm %s5397_s25, 256 }
  0x3f   : > { %s582_s7 = sshll.u32 %s581_s15, 4  ;;  %s583_s7 = int_to_ptr.hbm [resolvable:$true] %s582_s7 }
  0x40   : > { %s4096_s17 = sshra.s32 %s583_s7, 4  ;;  %s4097_s17 = int_to_ptr.hbm [resolvable:$true] %s4096_s17 }
  0x41   : > { %s4098_s29 = scalar_lea.hbm %s4097_s17, 128  ;;  %p4104_p0 = scmp.lt.s32.totalorder %s4097_s17, %s5397_s25 }
  0x42   : > { %p4099_p9 = scmp.ne.s32.totalorder %s4097_s17, %s4098_s29  ;;  %p4105_p5 = scmp.lt.s32.totalorder %s4103_s23, %s4098_s29 }
  0x44   : > { %p4101_p12 = pnand %p4100_p10, %p4099_p9  ;;  %p4106_p7 = por %p4105_p5, %p4104_p0 }
  0x46   : > { %p4102_p13 = pneg %p4101_p12 }
  0x48   : > { %p4107_p11 = pnand %p4106_p7, %p4102_p13 }
  0x4a   : > { %4110 = shalt.err (!%p4107_p11)
}
  0x4b   : > { %s4306_s16 = smov 128   ;;  %s4307_s18 = smov 8  }
  0x4c   : > { %3899 = dma.hbm_to_vmem [thread:$0]  (!%p4508_p2), %s583_s7, 2048, %s585_s21, %s572_s14, %s4306_s16, %s4306_s16, %s4307_s18  }
  0x4d   : > { %s3181_s22 = sshll.u32 %s4501_s19, 6  ;;  %s3755_s13 = sshll.u32 %s4298_s30, 6 }
  0x4e   : > { %s5399_s12 = sld [smem:[#allocation31_spill]]  ;;  %s598_s26 = scalar_lea.vmem [#allocation5], %s3181_s22 }
  0x4f   : > { %s607_s17 = sshll.u32 %s598_s26, 4  ;;  %s595_s23 = scalar_lea.sflag [#allocation6], %s594_s2  ;;  %s608_s17 = int_to_ptr.vmem [resolvable:$true] %s607_s17 }
  0x54   : > { %s604_s11 = scalar_lea.hbm %s5399_s12, %s3755_s13  ;;  %s4133_s19 = scalar_lea.hbm %s5399_s12, 128 }
  0x55   : > { %s605_s29 = sshll.u32 %s604_s11, 4  ;;  %s606_s29 = int_to_ptr.hbm [resolvable:$true] %s605_s29 }
  0x56   : > { %s4126_s15 = sshra.s32 %s606_s29, 4  ;;  %s4127_s15 = int_to_ptr.hbm [resolvable:$true] %s4126_s15 }
  0x57   : > { %s4128_s25 = scalar_lea.hbm %s4127_s15, 64  ;;  %p4134_p13 = scmp.lt.s32.totalorder %s4127_s15, %s5399_s12 }
  0x58   : > { %p4129_p11 = scmp.ne.s32.totalorder %s4127_s15, %s4128_s25  ;;  %p4135_p0 = scmp.lt.s32.totalorder %s4133_s19, %s4128_s25 }
  0x5a   : > { %p4131_p9 = pnand %p4129_p11, %p4100_p10  ;;  %p4136_p5 = por %p4135_p0, %p4134_p13 }
  0x5c   : > { %p4132_p12 = pneg %p4131_p9 }
  0x5e   : > { %p4137_p7 = pnand %p4136_p5, %p4132_p12 }
  0x60   : > { %4140 = shalt.err (!%p4137_p7)
}
  0x61   : > { %3902 = dma.hbm_to_vmem [thread:$0]  (!%p4508_p2), %s606_s29, 1024, %s608_s17, %s595_s23, %s4306_s16, %s4306_s16, %s4307_s18  }
  0x62   : > { %619 = sbr.rel (%p4451_p8) target bundleno = 1258 (0x4ea), region = 84  ;;  %s4546_s11 = sand.u32 (!%p4451_p8), 1, %s4290_s28  }
  0x63   : > { %s3186_s22 = sshll.u32 (!%p4451_p8), %s4546_s11, 7  ;;  %s622_s2 = scalar_lea.sflag (!%p4451_p8), [#allocation3], %s4546_s11 }
  0x64   : > { %s4552_s25 = scalar_lea.vmem (!%p4451_p8), [#allocation2], %s3186_s22 }
  0x67   : > { %4257 = dma.done.wait (%p4438_p4), %s622_s2, 2048  }
  0x68   : > { %4259 = vsyncadd (%p4438_p4), %s622_s2, 4294965248  ;;  %s631_s9 = sand.u32 1, %s4427_s0   ;;  %s3187_s24 = sshll.u32 %s4546_s11, 6 }
  0x69   : > { %s632_s18 = scalar_lea.sflag [#allocation6], %s631_s9  ;;  %s4564_s16 = scalar_lea.vmem [#allocation5], %s3187_s24 }
  0x6a   : > { %4261 = dma.done.wait (%p4438_p4), %s632_s18, 1024  }
  0x6b   : > { %4263 = vsyncadd (%p4438_p4), %s632_s18, 4294966272 }
  0x6c   : > { %4265 = dma.done.wait (%p64_p1), [#allocation6], 3072  }
  0x6d   : > { %4267 = vsyncadd (%p64_p1), [#allocation6], 4294964224 }
  0x6e   : > { %4269 = dma.done.wait (%p64_p1), [#allocation9], 6144  }
  0x6f   : > { %4271 = vsyncadd (%p64_p1), [#allocation9], 4294961152 }
  0x70   : > { %4273 = dma.done.wait (%p64_p1), [#allocation12], 3072  }
  0x71   : > { %4275 = vsyncadd (%p64_p1), [#allocation12], 4294964224  ;;  %v3763_v0 = vld [vmem:[#allocation7 + $0x38] sm:$0xff]  ;;  %v3762_v3 = vld [vmem:[#allocation7 + $0x30] sm:$0xff]  ;;  %vm761_vm0 = vcmask 1040384   ;;  %vm810_vm1 = vcmask 1046528  }
  0x72   : > { %v4582_v1 = vld [vmem:[#allocation7 + $0x78] sm:$0xff]  ;;  %1075 = vmatpush.bf16.msra.mxu0 %v3763_v0  ;;  %v4587_v4 = vld [vmem:[#allocation7 + $0x70] sm:$0xff]  ;;  %1414 = vmatpush.bf16.msra.mxu3 %v3763_v0  ;;  %v3761_v6 = vld [vmem:[#allocation7 + $0x28] sm:$0xff]  ;;  %vm4308_vm3 = vmmov 1   ;;  %s4889_s7 = scalar_lea.vmem [#allocation13], %s3186_s22  ;;  %s5407_s1 = sld [smem:[#allocation36_spill]] }
  0x73   : > { %v4584_v2 = vld [vmem:[#allocation7 + $0xb8] sm:$0xff]  ;;  %1124 = vmatpush.bf16.msra.mxu1 %v4582_v1  ;;  %v4590_v5 = vld [vmem:[#allocation7 + $0xb0] sm:$0xff]  ;;  %v4593_v7 = vld [vmem:[#allocation7 + $0x68] sm:$0xff]  ;;  %s5408_s26 = sld [smem:[#allocation37_spill]]  ;;  %s5191_s17 = scalar_lea.vmem [#allocation14], %s3187_s24 }
  0x74   : > { %1173 = vmatpush.bf16.msra.mxu2 %v4584_v2  ;;  %v4596_v8 = vld [vmem:[#allocation7 + $0xa8] sm:$0xff]  ;;  %v3760_v9 = vld [vmem:[#allocation7 + $0x20] sm:$0xff]  ;;  %v3759_v12 = vld [vmem:[#allocation7 + $0x18] sm:$0xff]  ;;  %s3855_s29 = sshll.u32 %s4427_s0, 6  ;;  %s5410_s14 = sld [smem:[#allocation41_spill]] }
  0x75   : > { %v4599_v10 = vld [vmem:[#allocation7 + $0x60] sm:$0xff]  ;;  %v4605_v13 = vld [vmem:[#allocation7 + $0x58] sm:$0xff]  ;;  %v3758_v15 = vld [vmem:[#allocation7 + $0x10] sm:$0xff]  ;;  %s3853_s21 = sshll.u32 %s4427_s0, 7  ;;  %s2953_s13 = sshll.u32 %s5191_s17, 4  ;;  %s2954_s13 = int_to_ptr.vmem [resolvable:$true] %s2953_s13 }
  0x76   : > { %1076 = vmatpush.bf16.msra.mxu0 %v3762_v3  ;;  %1415 = vmatpush.bf16.msra.mxu3 %v3762_v3  ;;  %v4601_v11 = vld [vmem:[#allocation7 + $0xa0] sm:$0xff]  ;;  %v4608_v14 = vld [vmem:[#allocation7 + $0x98] sm:$0xff]  ;;  %v4611_v16 = vld [vmem:[#allocation7 + $0x50] sm:$0xff]  ;;  %s5251_s2 = scalar_lea.sflag [#allocation15], %s631_s9 }
  0x77   : > { %1125 = vmatpush.bf16.msra.mxu1 %v4587_v4  ;;  %v4614_v17 = vld [vmem:[#allocation7 + $0x90] sm:$0xff]  ;;  %v4617_v18 = vld [vmem:[%s4552_s25] sm:$0xff]  ;;  %v4620_v19 = vld [vmem:[%s4552_s25 + $0x8] sm:$0xff] }
  0x78   : > { %1174 = vmatpush.bf16.msra.mxu2 %v4590_v5  ;;  %v4623_v20 = vld [vmem:[%s4552_s25 + $0x10] sm:$0xff]  ;;  %v3757_v21 = vld [vmem:[#allocation7 + $0x8] sm:$0xff]  ;;  %v762_v23 = vrot.slane %v4617_v18, 7  ;;  %v763_v24 = vrot.slane %v4620_v19, 7  ;;  %v811_v26 = vrot.slane %v4617_v18, 1  ;;  %v812_v27 = vrot.slane %v4620_v19, 1  ;;  %vm4640_vm2 = vmneg %vm761_vm0 }
  0x79   : > { %v4626_v22 = vld [vmem:[#allocation7 + $0x48] sm:$0xff]  ;;  %v814_v28 = vrot.slane %v4623_v20, 1  ;;  %v3756_v29 = vld [vmem:[#allocation7] sm:$0xff]  ;;  %v860_v37 = vpack.c.bf16 %v4620_v19, %v4617_v18  ;;  %vm4651_vm4 = vmpackc.low %vm4308_vm3, %vm4640_vm2  ;;  %v765_v41 = vrot.slane %v4623_v20, 7 }
  0x7a   : > { %1077 = vmatpush.bf16.msra.mxu0 %v3761_v6  ;;  %1416 = vmatpush.bf16.msra.mxu3 %v3761_v6  ;;  %v4631_v25 = vld [vmem:[#allocation7 + $0x88] sm:$0xff]  ;;  %v3764_v30 = vld [vmem:[#allocation7 + $0x40] sm:$0xff]  ;;  %v764_v31 = vsel %vm761_vm0, %v762_v23, %v763_v24  ;;  %v813_v34 = vsel %vm810_vm1, %v811_v26, %v812_v27  ;;  %v4660_v40 = vld [vmem:[%s4552_s25 + $0x18] sm:$0xff]  ;;  %s2952_s19 = scalar_lea.hbm %s5410_s14, %s3855_s29  ;;  %s4176_s27 = scalar_lea.hbm %s5410_s14, 128 }
  0x7b   : > { %1126 = vmatpush.bf16.msra.mxu1 %v4593_v7  ;;  %v3772_v32 = vld [vmem:[#allocation7 + $0x80] sm:$0xff]  ;;  %v815_v35 = vsel %vm810_vm1, %v812_v27, %v814_v28  ;;  %v3293_v36 = vpack.c.bf16 %v764_v31, %v762_v23  ;;  %v767_v42 = vrot.slane %v4660_v40, 7  ;;  %v816_v43 = vrot.slane %v4660_v40, 1  ;;  %vm4678_vm5 = vmpackc.low %vm810_vm1, %vm4308_vm3  ;;  %v4690_v52 = vld [vmem:[%s4552_s25 + $0x28] sm:$0xff]  ;;  %s2955_s22 = sshll.u32 %s2952_s19, 4  ;;  %s2956_s22 = int_to_ptr.hbm [resolvable:$true] %s2955_s22 }
  0x7c   : > { %1175 = vmatpush.bf16.msra.mxu2 %v4596_v8  ;;  %v861_v39 = vpack.c.bf16 %v815_v35, %v813_v34  ;;  %v766_v44 = vsel %vm761_vm0, %v763_v24, %v765_v41  ;;  %v863_v48 = vpack.c.bf16 %v4660_v40, %v4623_v20  ;;  %v4687_v51 = vld [vmem:[%s4552_s25 + $0x20] sm:$0xff]  ;;  %v4694_v53 = vld [vmem:[%s4552_s25 + $0x30] sm:$0xff]  ;;  %v770_v55 = vrot.slane %v4690_v52, 7  ;;  %v3833_v38 = vld [vmem:[#allocation11 + $0x28] sm:$0xff] }
  0x7d   : > { %v768_v45 = vsel %vm761_vm0, %v765_v41, %v767_v42  ;;  %v817_v46 = vsel %vm810_vm1, %v814_v28, %v816_v43  ;;  %v769_v54 = vrot.slane %v4687_v51, 7  ;;  %v818_v56 = vrot.slane %v4687_v51, 1  ;;  %v4746_v28 = vld [vmem:[%s4552_s25 + $0x58] sm:$0xff]  ;;  %v4759_v41 = vld [vmem:[%s4552_s25 + $0x60] sm:$0xff]  ;;  %v4762_v42 = vld [vmem:[%s4552_s25 + $0x68] sm:$0xff] }
  0x7e   : > { %1078 = vmatpush.bf16.msra.mxu0 %v3760_v9  ;;  %1417 = vmatpush.bf16.msra.mxu3 %v3760_v9  ;;  %v862_v47 = vpack.c.bf16 %v768_v45, %v766_v44  ;;  %v3308_v49 = vpack.c.bf16 %v816_v43, %v817_v46  ;;  %v819_v57 = vrot.slane %v4690_v52, 1  ;;  %v821_v58 = vrot.slane %v4694_v53, 1  ;;  %v4765_v43 = vld [vmem:[%s4552_s25 + $0x70] sm:$0xff]  ;;  %v3840_v50 = vld [vmem:[#allocation11 + $0x60] sm:$0xff]  ;;  %vm3731_vm6 = vmpackc.low %vm4640_vm2, %vm4640_vm2 }
  0x7f   : > { %1127 = vmatpush.bf16.msra.mxu1 %v4599_v10  ;;  %v771_v59 = vsel %vm761_vm0, %v769_v54, %v770_v55  ;;  %v866_v63 = vpack.c.bf16 %v4690_v52, %v4687_v51  ;;  %v830_v31 = vrot.slane %v4746_v28, 1  ;;  %v783_v44 = vrot.slane %v4759_v41, 7 }
  0x80   : > { %1176 = vmatpush.bf16.msra.mxu2 %v4601_v11  ;;  %v820_v60 = vsel %vm810_vm1, %v818_v56, %v819_v57  ;;  %v822_v61 = vsel %vm810_vm1, %v819_v57, %v821_v58  ;;  %v3297_v62 = vpack.c.bf16 %v771_v59, %v769_v54  ;;  %v784_v45 = vrot.slane %v4762_v42, 7  ;;  %v4780_v59 = vld [vmem:[%s4552_s25 + $0x78] sm:$0xff] }
  0x81   : > { %v867_v0 = vpack.c.bf16 %v822_v61, %v820_v60  ;;  %v832_v46 = vrot.slane %v4759_v41, 1  ;;  %v878_v57 = vpack.c.bf16 %v4762_v42, %v4759_v41  ;;  %v786_v60 = vrot.slane %v4765_v43, 7 }
  0x82   : > { %1079 = vmatpush.bf16.msra.mxu0 %v3759_v12  ;;  %1418 = vmatpush.bf16.msra.mxu3 %v3759_v12  ;;  %v4728_v12 = vld [vmem:[%s4552_s25 + $0x48] sm:$0xff]  ;;  %v788_v61 = vrot.slane %v4780_v59, 7 }
  0x83   : > { %1128 = vmatpush.bf16.msra.mxu1 %v4605_v13 }
  0x84   : > { %1177 = vmatpush.bf16.msra.mxu2 %v4608_v14 }
  0x86   : > { %1080 = vmatpush.bf16.msra.mxu0 %v3758_v15  ;;  %1419 = vmatpush.bf16.msra.mxu3 %v3758_v15  ;;  %v777_v15 = vrot.slane %v4728_v12, 7 }
  0x87   : > { %1129 = vmatpush.bf16.msra.mxu1 %v4611_v16 }
  0x88   : > { %1178 = vmatpush.bf16.msra.mxu2 %v4614_v17 }
  0x8a   : > { %1081 = vmatpush.bf16.msra.mxu0 %v3757_v21  ;;  %1420 = vmatpush.bf16.msra.mxu3 %v3757_v21 }
  0x8b   : > { %1130 = vmatpush.bf16.msra.mxu1 %v4626_v22 }
  0x8c   : > { %1179 = vmatpush.bf16.msra.mxu2 %v4631_v25 }
  0x8e   : > { %1082 = vmatpush.bf16.msra.mxu0 %v3756_v29  ;;  %1421 = vmatpush.bf16.msra.mxu3 %v3756_v29 }
  0x8f   : > { %1131 = vmatpush.bf16.msra.mxu1 %v3764_v30 }
  0x90   : > { %1180 = vmatpush.bf16.msra.mxu2 %v3772_v32 }
  0x91   : > { %3294 = vmatmul.msk.bf16.vlgmr.msra.gmra.mxu0 %vm4651_vm4, %v3293_v36 }
  0x92   : > { %1463 = vmatpush.bf16.msrb.mxu0 %v4582_v1  ;;  %1132 = vmatmul.bf16.vlgmr.msra.gmra.mxu1 %v860_v37  ;;  %v4712_v1 = vld [vmem:[%s4552_s25 + $0x38] sm:$0xff] }
  0x93   : > { %1512 = vmatpush.bf16.msrb.mxu1 %v4584_v2  ;;  %1181 = vmatmul.bf16.vlgmr.msra.gmra.mxu2 %v861_v39  ;;  %v772_v2 = vrot.slane %v4694_v53, 7  ;;  %v774_v3 = vrot.slane %v4712_v1, 7  ;;  %v869_v9 = vpack.c.bf16 %v4712_v1, %v4694_v53 }
  0x95   : > { %v775_v6 = vsel %vm761_vm0, %v772_v2, %v774_v3 }
  0x96   : > { %1464 = vmatpush.bf16.msrb.mxu0 %v4587_v4  ;;  %v823_v4 = vrot.slane %v4712_v1, 1 }
  0x97   : > { %1513 = vmatpush.bf16.msrb.mxu1 %v4590_v5  ;;  %v773_v5 = vsel %vm761_vm0, %v770_v55, %v772_v2 }
  0x9a   : > { %1465 = vmatpush.bf16.msrb.mxu0 %v4593_v7  ;;  %v824_v7 = vsel %vm810_vm1, %v821_v58, %v823_v4 }
  0x9b   : > { %1514 = vmatpush.bf16.msrb.mxu1 %v4596_v8  ;;  %v868_v8 = vpack.c.bf16 %v775_v6, %v773_v5 }
  0x9e   : > { %1466 = vmatpush.bf16.msrb.mxu0 %v4599_v10  ;;  %v3311_v10 = vpack.c.bf16 %v823_v4, %v824_v7  ;;  %v881_v4 = vpack.c.bf16 %v4780_v59, %v4765_v43 }
  0x9f   : > { %1515 = vmatpush.bf16.msrb.mxu1 %v4601_v11  ;;  %v4725_v11 = vld [vmem:[%s4552_s25 + $0x40] sm:$0xff] }
  0xa0   : > { %v872_v26 = vpack.c.bf16 %v4728_v12, %v4725_v11 }
  0xa1   : > { %1088 = vmatmul.bf16.gmra.mxu0 %v862_v47  ;;  %v833_v47 = vrot.slane %v4762_v42, 1 }
  0xa2   : > { %1467 = vmatpush.bf16.msrb.mxu0 %v4605_v13  ;;  %1137 = vmatmul.bf16.gmra.mxu1 %v863_v48  ;;  %v4731_v13 = vld [vmem:[%s4552_s25 + $0x50] sm:$0xff]  ;;  %v835_v48 = vrot.slane %v4765_v43, 1  ;;  %s5406_s25 = sld [smem:[#allocation35_spill]] }
  0xa3   : > { %1516 = vmatpush.bf16.msrb.mxu1 %v4608_v14  ;;  %3309 = vmatmul.msk.bf16.gmra.mxu2 %vm4678_vm5, %v3308_v49  ;;  %v776_v14 = vrot.slane %v4725_v11, 7  ;;  %v828_v21 = vrot.slane %v4731_v13, 1  ;;  %v779_v29 = vrot.slane %v4731_v13, 7  ;;  %v875_v37 = vpack.c.bf16 %v4746_v28, %v4731_v13 }
  0xa4   : > { %v785_v49 = vsel %vm761_vm0, %v783_v44, %v784_v45  ;;  %v834_v54 = vsel %vm810_vm1, %v832_v46, %v833_v47  ;;  %v836_v55 = vsel %vm810_vm1, %v833_v47, %v835_v48 }
  0xa5   : > { %v831_v35 = vsel %vm810_vm1, %v828_v21, %v830_v31  ;;  %v3305_v56 = vpack.c.bf16 %v785_v49, %v783_v44  ;;  %v879_v58 = vpack.c.bf16 %v836_v55, %v834_v54 }
  0xa6   : > { %1468 = vmatpush.bf16.msrb.mxu0 %v4611_v16  ;;  %v825_v16 = vrot.slane %v4725_v11, 1  ;;  %v3314_v39 = vpack.c.bf16 %v830_v31, %v831_v35 }
  0xa7   : > { %1517 = vmatpush.bf16.msrb.mxu1 %v4614_v17  ;;  %v826_v17 = vrot.slane %v4728_v12, 1 }
  0xa9   : > { %v827_v23 = vsel %vm810_vm1, %v825_v16, %v826_v17  ;;  %v829_v24 = vsel %vm810_vm1, %v826_v17, %v828_v21  ;;  %v4801_v21 = vld [vmem:[%s5338_s4] ss:$0 sm:$0xff] }
  0xaa   : > { %1469 = vmatpush.bf16.msrb.mxu0 %v4626_v22  ;;  %v778_v22 = vsel %vm761_vm0, %v776_v14, %v777_v15  ;;  %v873_v27 = vpack.c.bf16 %v829_v24, %v827_v23 }
  0xab   : > { %1518 = vmatpush.bf16.msrb.mxu1 %v4631_v25  ;;  %v3301_v25 = vpack.c.bf16 %v778_v22, %v776_v14  ;;  %v4795_v14 = vld [vmem:[%s5337_s3] ss:$0 sm:$0xff] }
  0xae   : > { %1470 = vmatpush.bf16.msrb.mxu0 %v3764_v30  ;;  %v781_v30 = vrot.slane %v4746_v28, 7 }
  0xaf   : > { %1519 = vmatpush.bf16.msrb.mxu1 %v3772_v32  ;;  %v780_v32 = vsel %vm761_vm0, %v777_v15, %v779_v29 }
  0xb0   : > { %v782_v34 = vsel %vm761_vm0, %v779_v29, %v781_v30 }
  0xb1   : > { %3298 = vmatmul.msk.bf16.gmra.mxu0 %vm4651_vm4, %v3297_v62  ;;  %v874_v36 = vpack.c.bf16 %v782_v34, %v780_v32  ;;  %v837_v62 = vrot.slane %v4780_v59, 1 }
  0xb2   : > { %1142 = vmatmul.bf16.gmra.mxu1 %v866_v63  ;;  %v787_v63 = vsel %vm761_vm0, %v784_v45, %v786_v60 }
  0xb3   : > { %1191 = vmatmul.bf16.gmra.mxu2 %v867_v0  ;;  %v789_v0 = vsel %vm761_vm0, %v786_v60, %v788_v61  ;;  %v838_v2 = vsel %vm810_vm1, %v835_v48, %v837_v62 }
  0xb4   : > { %v880_v3 = vpack.c.bf16 %v789_v0, %v787_v63  ;;  %v3317_v5 = vpack.c.bf16 %v837_v62, %v838_v2 }
  0xc1   : > { %1098 = vmatmul.bf16.gmra.mxu0 %v868_v8 }
  0xc2   : > { %1147 = vmatmul.bf16.gmra.mxu1 %v869_v9 }
  0xc3   : > { %3312 = vmatmul.msk.bf16.gmra.mxu2 %vm4678_vm5, %v3311_v10 }
  0xd1   : > { %3302 = vmatmul.msk.bf16.gmra.mxu0 %vm4651_vm4, %v3301_v25 }
  0xd2   : > { %1152 = vmatmul.bf16.gmra.mxu1 %v872_v26 }
  0xd3   : > { %1201 = vmatmul.bf16.gmra.mxu2 %v873_v27 }
  0xe1   : > { %1108 = vmatmul.bf16.gmra.mxu0 %v874_v36 }
  0xe2   : > { %1157 = vmatmul.bf16.gmra.mxu1 %v875_v37 }
  0xe3   : > { %3315 = vmatmul.msk.bf16.gmra.mxu2 %vm4678_vm5, %v3314_v39 }
  0xf1   : > { %3306 = vmatmul.msk.bf16.gmra.mxu0 %vm4651_vm4, %v3305_v56 }
  0xf2   : > { %1162 = vmatmul.bf16.gmra.mxu1 %v878_v57 }
  0xf3   : > { %1211 = vmatmul.bf16.gmra.mxu2 %v879_v58 }
 0x101   : > { %1118 = vmatmul.bf16.gmra.mxu0 %v880_v3 }
 0x102   : > { %1167 = vmatmul.bf16.gmra.mxu1 %v881_v4 }
 0x103   : > { %3318 = vmatmul.msk.bf16.gmra.mxu2 %vm4678_vm5, %v3317_v5 }
 0x10e   : > { %v1084_v6 = vpop.f32.mrf.mxu0 }
 0x10f   : > { %v1133_v7 = vpop.f32.mrf.mxu1 }
 0x110   : > { %v1134_v8 = vadd.f32 %v1133_v7, %v1084_v6 }
 0x116   : > { %v1182_v9 = vpop.f32.mrf.mxu2  ;;  %v1086_v15 = vpop.f32.mrf.mxu0 }
 0x117   : > { %v1183_v10 = vadd.f32 %v1182_v9, %v1134_v8  ;;  %v1135_v16 = vpop.f32.mrf.mxu1 }
 0x118   : > { %v1136_v22 = vadd.f32 %v1135_v16, %v1086_v15 }
 0x119   : > { %v1226_v17 = vmul.f32 %v4795_v14, %v1183_v10 }
 0x11b   : > { %v1246_v24 = vadd.f32 %v4801_v21, %v1226_v17 }
 0x11d   : > { %v1262_v30 = vmax.f32 %v1246_v24, 0.0 }
 0x11e   : > { %v1184_v23 = vpop.f32.mrf.mxu2  ;;  %v1089_v26 = vpop.f32.mrf.mxu0 }
 0x11f   : > { %v1185_v25 = vadd.f32 %v1184_v23, %v1136_v22  ;;  %v1138_v27 = vpop.f32.mrf.mxu1  ;;  %v1294_v45 = vrot.slane %v1262_v30, 7  ;;  %v1342_v63 = vrot.slane %v1262_v30, 1 }
 0x120   : > { %v1139_v32 = vadd.f32 %v1138_v27, %v1089_v26 }
 0x121   : > { %v1227_v29 = vmul.f32 %v4795_v14, %v1185_v25 }
 0x123   : > { %v1247_v31 = vadd.f32 %v4801_v21, %v1227_v29 }
 0x125   : > { %v1263_v34 = vmax.f32 %v1247_v31, 0.0 }
 0x126   : > { %v1187_v35 = vpop.f32.mrf.mxu2  ;;  %v1091_v37 = vpop.f32.mrf.mxu0 }
 0x127   : > { %v1188_v36 = vadd.f32 %v1187_v35, %v1139_v32  ;;  %v1140_v39 = vpop.f32.mrf.mxu1  ;;  %v1391_v44 = vpack.c.bf16 %v1263_v34, %v1262_v30  ;;  %v1295_v46 = vrot.slane %v1263_v34, 7  ;;  %v1343_v57 = vrot.slane %v1263_v34, 1 }
 0x128   : > { %v1141_v56 = vadd.f32 %v1140_v39, %v1091_v37 }
 0x129   : > { %v1228_v47 = vmul.f32 %v4795_v14, %v1188_v36  ;;  %1471 = vmatmul.bf16.vlgmr.msrb.gmra.mxu0 %v1391_v44  ;;  %v1296_v48 = vsel %vm761_vm0, %v1294_v45, %v1295_v46  ;;  %v1344_v3 = vsel %vm810_vm1, %v1342_v63, %v1343_v57 }
 0x12a   : > { %v3321_v49 = vpack.c.bf16 %v1296_v48, %v1294_v45 }
 0x12b   : > { %v1248_v54 = vadd.f32 %v4801_v21, %v1228_v47 }
 0x12c   : > { %3322 = vmatmul.msk.bf16.vlgmr.msra.gmra.mxu3 %vm4651_vm4, %v3321_v49 }
 0x12d   : > { %v1264_v55 = vmax.f32 %v1248_v54, 0.0 }
 0x12e   : > { %v1189_v58 = vpop.f32.mrf.mxu2  ;;  %v1094_v61 = vpop.f32.mrf.mxu0 }
 0x12f   : > { %v1190_v60 = vadd.f32 %v1189_v58, %v1141_v56  ;;  %v1143_v62 = vpop.f32.mrf.mxu1  ;;  %v1345_v0 = vrot.slane %v1264_v55, 1  ;;  %v1297_v9 = vrot.slane %v1264_v55, 7 }
 0x130   : > { %v1144_v7 = vadd.f32 %v1143_v62, %v1094_v61 }
 0x131   : > { %v1229_v2 = vmul.f32 %v4795_v14, %v1190_v60  ;;  %v1346_v4 = vsel %vm810_vm1, %v1343_v57, %v1345_v0  ;;  %v1298_v24 = vsel %vm761_vm0, %v1295_v46, %v1297_v9 }
 0x132   : > { %v1392_v5 = vpack.c.bf16 %v1346_v4, %v1344_v3 }
 0x133   : > { %v1249_v6 = vadd.f32 %v4801_v21, %v1229_v2 }
 0x134   : > { %1520 = vmatmul.bf16.vlgmr.msrb.gmra.mxu1 %v1392_v5 }
 0x135   : > { %v1265_v8 = vmax.f32 %v1249_v6, 0.0 }
 0x136   : > { %v1192_v10 = vpop.f32.mrf.mxu2  ;;  %v1096_v16 = vpop.f32.mrf.mxu0 }
 0x137   : > { %v1193_v15 = vadd.f32 %v1192_v10, %v1144_v7  ;;  %v1145_v17 = vpop.f32.mrf.mxu1  ;;  %v1394_v22 = vpack.c.bf16 %v1265_v8, %v1264_v55  ;;  %v1299_v23 = vrot.slane %v1265_v8, 7  ;;  %v1347_v29 = vrot.slane %v1265_v8, 1 }
 0x138   : > { %v1146_v30 = vadd.f32 %v1145_v17, %v1096_v16 }
 0x139   : > { %1476 = vmatmul.bf16.gmra.mxu0 %v1394_v22  ;;  %v1300_v25 = vsel %vm761_vm0, %v1297_v9, %v1299_v23  ;;  %v1230_v27 = vmul.f32 %v4795_v14, %v1193_v15  ;;  %v1348_v37 = vsel %vm810_vm1, %v1345_v0, %v1347_v29 }
 0x13a   : > { %v1393_v26 = vpack.c.bf16 %v1300_v25, %v1298_v24  ;;  %v3336_v44 = vpack.c.bf16 %v1347_v29, %v1348_v37 }
 0x13b   : > { %v1250_v32 = vadd.f32 %v4801_v21, %v1230_v27 }
 0x13c   : > { %1427 = vmatmul.bf16.gmra.mxu3 %v1393_v26 }
 0x13d   : > { %v1266_v45 = vmax.f32 %v1250_v32, 0.0 }
 0x13e   : > { %v1194_v31 = vpop.f32.mrf.mxu2  ;;  %v1099_v35 = vpop.f32.mrf.mxu0 }
 0x13f   : > { %v1195_v34 = vadd.f32 %v1194_v31, %v1146_v30  ;;  %v1148_v36 = vpop.f32.mrf.mxu1  ;;  %v1301_v58 = vrot.slane %v1266_v45, 7  ;;  %v1349_v9 = vrot.slane %v1266_v45, 1 }
 0x140   : > { %v1149_v47 = vadd.f32 %v1148_v36, %v1099_v35 }
 0x141   : > { %v1231_v39 = vmul.f32 %v4795_v14, %v1195_v34 }
 0x143   : > { %v1251_v46 = vadd.f32 %v4801_v21, %v1231_v39 }
 0x144   : > { %3337 = vmatmul.msk.bf16.gmra.mxu1 %vm4678_vm5, %v3336_v44 }
 0x145   : > { %v1267_v48 = vmax.f32 %v1251_v46, 0.0 }
 0x146   : > { %v1197_v49 = vpop.f32.mrf.mxu2  ;;  %v1101_v55 = vpop.f32.mrf.mxu0 }
 0x147   : > { %v1198_v54 = vadd.f32 %v1197_v49, %v1149_v47  ;;  %v1150_v56 = vpop.f32.mrf.mxu1  ;;  %v1397_v57 = vpack.c.bf16 %v1267_v48, %v1266_v45  ;;  %v1302_v60 = vrot.slane %v1267_v48, 7  ;;  %v1350_v4 = vrot.slane %v1267_v48, 1 }
 0x148   : > { %v1151_v3 = vadd.f32 %v1150_v56, %v1101_v55 }
 0x149   : > { %v1232_v61 = vmul.f32 %v4795_v14, %v1198_v54  ;;  %1481 = vmatmul.bf16.gmra.mxu0 %v1397_v57  ;;  %v1303_v62 = vsel %vm761_vm0, %v1301_v58, %v1302_v60  ;;  %v1351_v16 = vsel %vm810_vm1, %v1349_v9, %v1350_v4 }
 0x14a   : > { %v3325_v63 = vpack.c.bf16 %v1303_v62, %v1301_v58 }
 0x14b   : > { %v1252_v0 = vadd.f32 %v4801_v21, %v1232_v61 }
 0x14c   : > { %3326 = vmatmul.msk.bf16.gmra.mxu3 %vm4651_vm4, %v3325_v63 }
 0x14d   : > { %v1268_v2 = vmax.f32 %v1252_v0, 0.0 }
 0x14e   : > { %v1199_v5 = vpop.f32.mrf.mxu2  ;;  %v1104_v7 = vpop.f32.mrf.mxu0 }
 0x14f   : > { %v1200_v6 = vadd.f32 %v1199_v5, %v1151_v3  ;;  %v1153_v8 = vpop.f32.mrf.mxu1  ;;  %v1352_v10 = vrot.slane %v1268_v2, 1  ;;  %v1304_v26 = vrot.slane %v1268_v2, 7 }
 0x150   : > { %v1154_v24 = vadd.f32 %v1153_v8, %v1104_v7 }
 0x151   : > { %v1233_v15 = vmul.f32 %v4795_v14, %v1200_v6  ;;  %v1353_v17 = vsel %vm810_vm1, %v1350_v4, %v1352_v10  ;;  %v1305_v35 = vsel %vm761_vm0, %v1302_v60, %v1304_v26 }
 0x152   : > { %v1398_v22 = vpack.c.bf16 %v1353_v17, %v1351_v16 }
 0x153   : > { %v1253_v23 = vadd.f32 %v4801_v21, %v1233_v15 }
 0x154   : > { %1530 = vmatmul.bf16.gmra.mxu1 %v1398_v22 }
 0x155   : > { %v1269_v25 = vmax.f32 %v1253_v23, 0.0 }
 0x156   : > { %v1202_v27 = vpop.f32.mrf.mxu2  ;;  %v1106_v30 = vpop.f32.mrf.mxu0 }
 0x157   : > { %v1203_v29 = vadd.f32 %v1202_v27, %v1154_v24  ;;  %v1155_v31 = vpop.f32.mrf.mxu1  ;;  %v1400_v32 = vpack.c.bf16 %v1269_v25, %v1268_v2  ;;  %v1306_v34 = vrot.slane %v1269_v25, 7  ;;  %v1354_v44 = vrot.slane %v1269_v25, 1 }
 0x158   : > { %v1156_v45 = vadd.f32 %v1155_v31, %v1106_v30 }
 0x159   : > { %1486 = vmatmul.bf16.gmra.mxu0 %v1400_v32  ;;  %v1307_v36 = vsel %vm761_vm0, %v1304_v26, %v1306_v34  ;;  %v1234_v39 = vmul.f32 %v4795_v14, %v1203_v29  ;;  %v1355_v55 = vsel %vm810_vm1, %v1352_v10, %v1354_v44 }
 0x15a   : > { %v1399_v37 = vpack.c.bf16 %v1307_v36, %v1305_v35  ;;  %v3339_v57 = vpack.c.bf16 %v1354_v44, %v1355_v55 }
 0x15b   : > { %v1254_v47 = vadd.f32 %v4801_v21, %v1234_v39  ;;  %v3787_v39 = vld [vmem:[#allocation8 + $0x38] sm:$0xff] }
 0x15c   : > { %1437 = vmatmul.bf16.gmra.mxu3 %v1399_v37  ;;  %1920 = vmatpush.bf16.msrb.mxu2 %v3787_v39 }
 0x15d   : > { %v1270_v58 = vmax.f32 %v1254_v47, 0.0 }
 0x15e   : > { %v1204_v46 = vpop.f32.mrf.mxu2  ;;  %v1109_v49 = vpop.f32.mrf.mxu0 }
 0x15f   : > { %v1205_v48 = vadd.f32 %v1204_v46, %v1156_v45  ;;  %v1158_v54 = vpop.f32.mrf.mxu1  ;;  %v1308_v5 = vrot.slane %v1270_v58, 7  ;;  %v1356_v26 = vrot.slane %v1270_v58, 1 }
 0x160   : > { %v1159_v61 = vadd.f32 %v1158_v54, %v1109_v49 }
 0x161   : > { %v1235_v56 = vmul.f32 %v4795_v14, %v1205_v48 }
 0x163   : > { %v1255_v60 = vadd.f32 %v4801_v21, %v1235_v56 }
 0x164   : > { %3340 = vmatmul.msk.bf16.gmra.mxu1 %vm4678_vm5, %v3339_v57 }
 0x165   : > { %v1271_v62 = vmax.f32 %v1255_v60, 0.0  ;;  %v3786_v60 = vld [vmem:[#allocation8 + $0x30] sm:$0xff] }
 0x166   : > { %v1207_v63 = vpop.f32.mrf.mxu2  ;;  %v1111_v2 = vpop.f32.mrf.mxu0  ;;  %1921 = vmatpush.bf16.msrb.mxu2 %v3786_v60 }
 0x167   : > { %v1208_v0 = vadd.f32 %v1207_v63, %v1159_v61  ;;  %v1160_v3 = vpop.f32.mrf.mxu1  ;;  %v1403_v4 = vpack.c.bf16 %v1271_v62, %v1270_v58  ;;  %v1309_v6 = vrot.slane %v1271_v62, 7  ;;  %v1357_v17 = vrot.slane %v1271_v62, 1 }
 0x168   : > { %v1161_v16 = vadd.f32 %v1160_v3, %v1111_v2 }
 0x169   : > { %v1236_v7 = vmul.f32 %v4795_v14, %v1208_v0  ;;  %1491 = vmatmul.bf16.gmra.mxu0 %v1403_v4  ;;  %v1310_v8 = vsel %vm761_vm0, %v1308_v5, %v1309_v6  ;;  %v1358_v30 = vsel %vm810_vm1, %v1356_v26, %v1357_v17 }
 0x16a   : > { %v3329_v9 = vpack.c.bf16 %v1310_v8, %v1308_v5 }
 0x16b   : > { %v1256_v10 = vadd.f32 %v4801_v21, %v1236_v7 }
 0x16c   : > { %3330 = vmatmul.msk.bf16.gmra.mxu3 %vm4651_vm4, %v3329_v9 }
 0x16d   : > { %v1272_v15 = vmax.f32 %v1256_v10, 0.0 }
 0x16e   : > { %v1209_v22 = vpop.f32.mrf.mxu2  ;;  %v1114_v24 = vpop.f32.mrf.mxu0 }
 0x16f   : > { %v1210_v23 = vadd.f32 %v1209_v22, %v1161_v16  ;;  %v1163_v25 = vpop.f32.mrf.mxu1  ;;  %v1359_v27 = vrot.slane %v1272_v15, 1  ;;  %v1311_v37 = vrot.slane %v1272_v15, 7 }
 0x170   : > { %v1164_v35 = vadd.f32 %v1163_v25, %v1114_v24 }
 0x171   : > { %v1237_v29 = vmul.f32 %v4795_v14, %v1210_v23  ;;  %v1360_v31 = vsel %vm810_vm1, %v1357_v17, %v1359_v27  ;;  %v1312_v54 = vsel %vm761_vm0, %v1309_v6, %v1311_v37 }
 0x172   : > { %v1404_v32 = vpack.c.bf16 %v1360_v31, %v1358_v30 }
 0x173   : > { %v1257_v34 = vadd.f32 %v4801_v21, %v1237_v29 }
 0x174   : > { %1540 = vmatmul.bf16.gmra.mxu1 %v1404_v32 }
 0x175   : > { %v1273_v36 = vmax.f32 %v1257_v34, 0.0 }
 0x176   : > { %v1212_v44 = vpop.f32.mrf.mxu2  ;;  %v1116_v46 = vpop.f32.mrf.mxu0 }
 0x177   : > { %v1213_v45 = vadd.f32 %v1212_v44, %v1164_v35  ;;  %v1165_v47 = vpop.f32.mrf.mxu1  ;;  %v1406_v48 = vpack.c.bf16 %v1273_v36, %v1272_v15  ;;  %v1313_v49 = vrot.slane %v1273_v36, 7  ;;  %v1361_v58 = vrot.slane %v1273_v36, 1 }
 0x178   : > { %v1166_v61 = vadd.f32 %v1165_v47, %v1116_v46 }
 0x179   : > { %1496 = vmatmul.bf16.gmra.mxu0 %v1406_v48  ;;  %v1314_v55 = vsel %vm761_vm0, %v1311_v37, %v1313_v49  ;;  %v1238_v57 = vmul.f32 %v4795_v14, %v1213_v45  ;;  %v1362_v2 = vsel %vm810_vm1, %v1359_v27, %v1361_v58 }
 0x17a   : > { %v1405_v56 = vpack.c.bf16 %v1314_v55, %v1312_v54  ;;  %v3342_v6 = vpack.c.bf16 %v1361_v58, %v1362_v2  ;;  %v3793_v2 = vld [vmem:[#allocation8 + $0x68] sm:$0xff] }
 0x17b   : > { %v1258_v63 = vadd.f32 %v4801_v21, %v1238_v57 }
 0x17c   : > { %1447 = vmatmul.bf16.gmra.mxu3 %v1405_v56 }
 0x17d   : > { %v1274_v7 = vmax.f32 %v1258_v63, 0.0 }
 0x17e   : > { %v1214_v62 = vpop.f32.mrf.mxu2  ;;  %v1119_v3 = vpop.f32.mrf.mxu0 }
 0x17f   : > { %v1215_v0 = vadd.f32 %v1214_v62, %v1166_v61  ;;  %v1168_v4 = vpop.f32.mrf.mxu1  ;;  %v1315_v22 = vrot.slane %v1274_v7, 7  ;;  %v1363_v37 = vrot.slane %v1274_v7, 1  ;;  %v3795_v62 = vld [vmem:[#allocation8 + $0x78] sm:$0xff] }
 0x180   : > { %v1169_v9 = vadd.f32 %v1168_v4, %v1119_v3  ;;  %1949 = vmatpush.bf16.msrb.mxu3 %v3795_v62  ;;  %v3792_v4 = vld [vmem:[#allocation8 + $0x60] sm:$0xff] }
 0x181   : > { %v1239_v5 = vmul.f32 %v4795_v14, %v1215_v0 }
 0x183   : > { %v1259_v8 = vadd.f32 %v4801_v21, %v1239_v5  ;;  %v3784_v5 = vld [vmem:[#allocation8 + $0x20] sm:$0xff] }
 0x184   : > { %3343 = vmatmul.msk.bf16.gmra.mxu1 %vm4678_vm5, %v3342_v6  ;;  %v3791_v6 = vld [vmem:[#allocation8 + $0x58] sm:$0xff] }
 0x185   : > { %v1275_v10 = vmax.f32 %v1259_v8, 0.0 }
 0x186   : > { %v1217_v15 = vpop.f32.mrf.mxu2  ;;  %v1121_v26 = vpop.f32.mrf.mxu0 }
 0x187   : > { %v1218_v16 = vadd.f32 %v1217_v15, %v1169_v9  ;;  %v1409_v17 = vpack.c.bf16 %v1275_v10, %v1274_v7  ;;  %v1316_v23 = vrot.slane %v1275_v10, 7  ;;  %v1170_v27 = vpop.f32.mrf.mxu1  ;;  %v1364_v34 = vrot.slane %v1275_v10, 1  ;;  %v4877_v10 = vld [vmem:[%s5339_s5] ss:$0 sm:$0xff]  ;;  %v3783_v15 = vld [vmem:[#allocation8 + $0x18] sm:$0xff] }
 0x188   : > { %v1171_v32 = vadd.f32 %v1170_v27, %v1121_v26  ;;  %v3789_v26 = vld [vmem:[#allocation8 + $0x48] sm:$0xff] }
 0x189   : > { %v1240_v24 = vmul.f32 %v4795_v14, %v1218_v16  ;;  %1501 = vmatmul.bf16.gmra.mxu0 %v1409_v17  ;;  %v1317_v25 = vsel %vm761_vm0, %v1315_v22, %v1316_v23  ;;  %v1365_v45 = vsel %vm810_vm1, %v1363_v37, %v1364_v34  ;;  %v3790_v17 = vld [vmem:[#allocation8 + $0x50] sm:$0xff] }
 0x18a   : > { %v3333_v29 = vpack.c.bf16 %v1317_v25, %v1315_v22  ;;  %v3782_v25 = vld [vmem:[#allocation8 + $0x10] sm:$0xff] }
 0x18b   : > { %v1260_v30 = vadd.f32 %v4801_v21, %v1240_v24 }
 0x18c   : > { %3334 = vmatmul.msk.bf16.gmra.mxu3 %vm4651_vm4, %v3333_v29 }
 0x18d   : > { %v1276_v31 = vmax.f32 %v1260_v30, 0.0 }
 0x18e   : > { %v1219_v35 = vpop.f32.mrf.mxu2 }
 0x18f   : > { %v1220_v36 = vadd.f32 %v1219_v35, %v1171_v32  ;;  %v1366_v39 = vrot.slane %v1276_v31, 1  ;;  %v1318_v54 = vrot.slane %v1276_v31, 7 }
 0x191   : > { %v1241_v44 = vmul.f32 %v4795_v14, %v1220_v36  ;;  %v1367_v46 = vsel %vm810_vm1, %v1364_v34, %v1366_v39  ;;  %v1319_v57 = vsel %vm761_vm0, %v1316_v23, %v1318_v54  ;;  %v3785_v14 = vld [vmem:[#allocation8 + $0x28] sm:$0xff]  ;;  %v4882_v23 = vld [vmem:[%s5340_s6] ss:$0 sm:$0xff] }
 0x192   : > { %v1410_v47 = vpack.c.bf16 %v1367_v46, %v1365_v45  ;;  %1922 = vmatpush.bf16.msrb.mxu2 %v3785_v14  ;;  %v3781_v34 = vld [vmem:[#allocation8 + $0x8] sm:$0xff]  ;;  %v3788_v36 = vld [vmem:[#allocation8 + $0x40] sm:$0xff] }
 0x193   : > { %v1261_v48 = vadd.f32 %v4801_v21, %v1241_v44  ;;  %v3794_v21 = vld [vmem:[#allocation8 + $0x70] sm:$0xff]  ;;  %v3780_v45 = vld [vmem:[#allocation8] sm:$0xff] }
 0x194   : > { %1550 = vmatmul.bf16.gmra.mxu1 %v1410_v47  ;;  %1950 = vmatpush.bf16.msrb.mxu3 %v3794_v21 }
 0x195   : > { %v1277_v49 = vmax.f32 %v1261_v48, 0.0 }
 0x196   : > { %1923 = vmatpush.bf16.msrb.mxu2 %v3784_v5 }
 0x197   : > { %v1412_v55 = vpack.c.bf16 %v1277_v49, %v1276_v31  ;;  %v1320_v56 = vrot.slane %v1277_v49, 7  ;;  %v1368_v61 = vrot.slane %v1277_v49, 1 }
 0x198   : > { %1951 = vmatpush.bf16.msrb.mxu3 %v3793_v2 }
 0x199   : > { %1506 = vmatmul.bf16.gmra.mxu0 %v1412_v55  ;;  %v1321_v58 = vsel %vm761_vm0, %v1318_v54, %v1320_v56  ;;  %v1369_v63 = vsel %vm810_vm1, %v1366_v39, %v1368_v61 }
 0x19a   : > { %v1411_v60 = vpack.c.bf16 %v1321_v58, %v1319_v57  ;;  %v3345_v0 = vpack.c.bf16 %v1368_v61, %v1369_v63  ;;  %1924 = vmatpush.bf16.msrb.mxu2 %v3783_v15 }
 0x19c   : > { %1457 = vmatmul.bf16.gmra.mxu3 %v1411_v60 }
 0x19d   : > { %1952 = vmatpush.bf16.msrb.mxu3 %v3792_v4 }
 0x19e   : > { %1925 = vmatpush.bf16.msrb.mxu2 %v3782_v25 }
 0x1a1   : > { %1953 = vmatpush.bf16.msrb.mxu3 %v3791_v6 }
 0x1a2   : > { %1926 = vmatpush.bf16.msrb.mxu2 %v3781_v34 }
 0x1a4   : > { %3346 = vmatmul.msk.bf16.gmra.mxu1 %vm4678_vm5, %v3345_v0 }
 0x1a5   : > { %1954 = vmatpush.bf16.msrb.mxu3 %v3790_v17 }
 0x1a6   : > { %v1472_v3 = vpop.f32.mrf.mxu0  ;;  %1927 = vmatpush.bf16.msrb.mxu2 %v3780_v45 }
 0x1a9   : > { %1955 = vmatpush.bf16.msrb.mxu3 %v3789_v26 }
 0x1ad   : > { %1956 = vmatpush.bf16.msrb.mxu3 %v3788_v36 }
 0x1ae   : > { %v1474_v7 = vpop.f32.mrf.mxu0 }
 0x1af   : > { %v1423_v8 = vpop.f32.mrf.mxu3 }
 0x1b0   : > { %v1473_v9 = vadd.f32 %v1472_v3, %v1423_v8 }
 0x1b1   : > { %v1521_v16 = vpop.f32.mrf.mxu1 }
 0x1b2   : > { %v1522_v22 = vadd.f32 %v1521_v16, %v1473_v9 }
 0x1b4   : > { %v1565_v24 = vmul.f32 %v4877_v10, %v1522_v22 }
 0x1b6   : > { %v1585_v27 = vadd.f32 %v4882_v23, %v1565_v24  ;;  %v1477_v29 = vpop.f32.mrf.mxu0 }
 0x1b7   : > { %v1425_v30 = vpop.f32.mrf.mxu3 }
 0x1b8   : > { %v1601_v31 = vadd.f32 %v1585_v27, %v4617_v18  ;;  %v1475_v32 = vadd.f32 %v1474_v7, %v1425_v30 }
 0x1b9   : > { %v1523_v35 = vpop.f32.mrf.mxu1 }
 0x1ba   : > { %v1617_v37 = vmax.f32 %v1601_v31, 0.0  ;;  %v1524_v39 = vadd.f32 %v1523_v35, %v1475_v32 }
 0x1bc   : > { %1633 = vst [vmem:[%s4889_s7] sm:$0xff] %v1617_v37  ;;  %v1566_v44 = vmul.f32 %v4877_v10, %v1524_v39 }
 0x1be   : > { %v1586_v46 = vadd.f32 %v4882_v23, %v1566_v44  ;;  %v1479_v18 = vpop.f32.mrf.mxu0 }
 0x1bf   : > { %v1428_v47 = vpop.f32.mrf.mxu3 }
 0x1c0   : > { %v1602_v48 = vadd.f32 %v1586_v46, %v4620_v19  ;;  %v1478_v49 = vadd.f32 %v1477_v29, %v1428_v47 }
 0x1c1   : > { %v1526_v54 = vpop.f32.mrf.mxu1 }
 0x1c2   : > { %v1618_v55 = vmax.f32 %v1602_v48, 0.0  ;;  %v1527_v56 = vadd.f32 %v1526_v54, %v1478_v49 }
 0x1c4   : > { %1634 = vst [vmem:[%s4889_s7 + $0x8] sm:$0xff] %v1618_v55  ;;  %v1567_v57 = vmul.f32 %v4877_v10, %v1527_v56 }
 0x1c6   : > { %v1587_v58 = vadd.f32 %v4882_v23, %v1567_v57  ;;  %v1482_v60 = vpop.f32.mrf.mxu0 }
 0x1c7   : > { %v1430_v61 = vpop.f32.mrf.mxu3 }
 0x1c8   : > { %v1603_v14 = vadd.f32 %v1587_v58, %v4623_v20  ;;  %v1480_v62 = vadd.f32 %v1479_v18, %v1430_v61 }
 0x1c9   : > { %v1528_v63 = vpop.f32.mrf.mxu1 }
 0x1ca   : > { %v1619_v21 = vmax.f32 %v1603_v14, 0.0  ;;  %v1529_v0 = vadd.f32 %v1528_v63, %v1480_v62 }
 0x1cb   : > { %v4908_v25 = vld [vmem:[%s4889_s7 + $0x1] ss:$2 sm:$0xff]  ;;  %v1649_v29 = vld [vmem:[%s4889_s7] ss:$2 sm:$0xff] }
 0x1cc   : > { %1635 = vst [vmem:[%s4889_s7 + $0x10] sm:$0xff] %v1619_v21  ;;  %v1568_v19 = vmul.f32 %v4877_v10, %v1529_v0  ;;  %v1688_v32 = vrot.slane %v4908_v25, 7 }
 0x1ce   : > { %v1588_v2 = vadd.f32 %v4882_v23, %v1568_v19  ;;  %v1484_v3 = vpop.f32.mrf.mxu0 }
 0x1cf   : > { %v1433_v4 = vpop.f32.mrf.mxu3 }
 0x1d0   : > { %v1604_v5 = vadd.f32 %v1588_v2, %v4660_v40  ;;  %v1483_v6 = vadd.f32 %v1482_v60, %v1433_v4 }
 0x1d1   : > { %v1531_v7 = vpop.f32.mrf.mxu1 }
 0x1d2   : > { %v1620_v20 = vmax.f32 %v1604_v5, 0.0  ;;  %v1532_v8 = vadd.f32 %v1531_v7, %v1483_v6 }
 0x1d4   : > { %1636 = vst [vmem:[%s4889_s7 + $0x18] sm:$0xff] %v1620_v20  ;;  %v1569_v9 = vmul.f32 %v4877_v10, %v1532_v8 }
 0x1d6   : > { %v1589_v15 = vadd.f32 %v4882_v23, %v1569_v9  ;;  %v1487_v16 = vpop.f32.mrf.mxu0 }
 0x1d7   : > { %v1435_v17 = vpop.f32.mrf.mxu3 }
 0x1d8   : > { %v1605_v22 = vadd.f32 %v1589_v15, %v4687_v51  ;;  %v1485_v24 = vadd.f32 %v1484_v3, %v1435_v17 }
 0x1d9   : > { %v1533_v40 = vpop.f32.mrf.mxu1 }
 0x1da   : > { %v1621_v26 = vmax.f32 %v1605_v22, 0.0  ;;  %v1534_v27 = vadd.f32 %v1533_v40, %v1485_v24 }
 0x1db   : > { %v3347_v30 = vld [vmem:[%s4889_s7 + $0x10] ss:$2 sm:$0xff]  ;;  %v4913_v31 = vld [vmem:[%s4889_s7 + $0x11] ss:$2 sm:$0xff] }
 0x1dc   : > { %1637 = vst [vmem:[%s4889_s7 + $0x20] sm:$0xff] %v1621_v26  ;;  %v1570_v34 = vmul.f32 %v4877_v10, %v1534_v27  ;;  %v1713_v35 = vpack.c.bf16 %v3347_v30, %v1649_v29  ;;  %v1689_v36 = vrot.slane %v4913_v31, 7  ;;  %v1714_v51 = vpack.c.bf16 %v4913_v31, %v4908_v25  ;;  %v3824_v25 = vld [vmem:[#allocation10 + $0xa0] sm:$0xff]  ;;  %v3811_v31 = vld [vmem:[#allocation10 + $0x38] sm:$0xff] }
 0x1dd   : > { %2291 = vmatpush.bf16.msra.mxu3 %v3811_v31 }
 0x1de   : > { %v1590_v37 = vadd.f32 %v4882_v23, %v1570_v34  ;;  %v1489_v39 = vpop.f32.mrf.mxu0  ;;  %1957 = vmatmul.bf16.vlgmr.msrb.gmra.mxu3 %v1713_v35  ;;  %v1690_v44 = vsel %vm761_vm0, %v1688_v32, %v1689_v36 }
 0x1df   : > { %v1438_v45 = vpop.f32.mrf.mxu3  ;;  %v3460_v46 = vpack.c.bf16 %v1690_v44, %v1688_v32 }
 0x1e0   : > { %v1606_v18 = vadd.f32 %v1590_v37, %v4690_v52  ;;  %v1488_v47 = vadd.f32 %v1487_v16, %v1438_v45 }
 0x1e1   : > { %v1536_v48 = vpop.f32.mrf.mxu1  ;;  %3461 = vmatmul.msk.bf16.vlgmr.msrb.gmra.mxu2 %vm4651_vm4, %v3460_v46 }
 0x1e2   : > { %v1622_v49 = vmax.f32 %v1606_v18, 0.0  ;;  %v1537_v54 = vadd.f32 %v1536_v48, %v1488_v47 }
 0x1e4   : > { %1638 = vst [vmem:[%s4889_s7 + $0x28] sm:$0xff] %v1622_v49  ;;  %v1571_v55 = vmul.f32 %v4877_v10, %v1537_v54  ;;  %v3802_v54 = vld [vmem:[#allocation8 + $0xb0] sm:$0xff] }
 0x1e6   : > { %v1591_v56 = vadd.f32 %v4882_v23, %v1571_v55  ;;  %v1492_v57 = vpop.f32.mrf.mxu0 }
 0x1e7   : > { %v1440_v58 = vpop.f32.mrf.mxu3 }
 0x1e8   : > { %v1607_v60 = vadd.f32 %v1591_v56, %v4694_v53  ;;  %v1490_v61 = vadd.f32 %v1489_v39, %v1440_v58 }
 0x1e9   : > { %v1538_v52 = vpop.f32.mrf.mxu1 }
 0x1ea   : > { %v1623_v14 = vmax.f32 %v1607_v60, 0.0  ;;  %v1539_v62 = vadd.f32 %v1538_v52, %v1490_v61 }
 0x1eb   : > { %v4939_v16 = vld [vmem:[%s4889_s7 + $0x21] ss:$2 sm:$0xff]  ;;  %v3348_v24 = vld [vmem:[%s4889_s7 + $0x20] ss:$2 sm:$0xff] }
 0x1ec   : > { %1639 = vst [vmem:[%s4889_s7 + $0x30] sm:$0xff] %v1623_v14  ;;  %v1572_v63 = vmul.f32 %v4877_v10, %v1539_v62  ;;  %v1691_v27 = vrot.slane %v4939_v16, 7  ;;  %v3801_v62 = vld [vmem:[#allocation8 + $0xa8] sm:$0xff] }
 0x1ee   : > { %v1592_v21 = vadd.f32 %v4882_v23, %v1572_v63  ;;  %v1494_v0 = vpop.f32.mrf.mxu0 }
 0x1ef   : > { %v1443_v19 = vpop.f32.mrf.mxu3 }
 0x1f0   : > { %v1608_v2 = vadd.f32 %v1592_v21, %v4712_v1  ;;  %v1493_v3 = vadd.f32 %v1492_v57, %v1443_v19 }
 0x1f1   : > { %v1541_v4 = vpop.f32.mrf.mxu1 }
 0x1f2   : > { %v1624_v53 = vmax.f32 %v1608_v2, 0.0  ;;  %v1542_v5 = vadd.f32 %v1541_v4, %v1493_v3 }
 0x1f4   : > { %1640 = vst [vmem:[%s4889_s7 + $0x38] sm:$0xff] %v1624_v53  ;;  %v1573_v6 = vmul.f32 %v4877_v10, %v1542_v5  ;;  %v3800_v5 = vld [vmem:[#allocation8 + $0xa0] sm:$0xff] }
 0x1f6   : > { %v1593_v7 = vadd.f32 %v4882_v23, %v1573_v6  ;;  %v1497_v20 = vpop.f32.mrf.mxu0 }
 0x1f7   : > { %v1445_v8 = vpop.f32.mrf.mxu3 }
 0x1f8   : > { %v1609_v9 = vadd.f32 %v1593_v7, %v4725_v11  ;;  %v1495_v15 = vadd.f32 %v1494_v0, %v1445_v8  ;;  %v3803_v11 = vld [vmem:[#allocation8 + $0xb8] sm:$0xff] }
 0x1f9   : > { %v1543_v1 = vpop.f32.mrf.mxu1  ;;  %1978 = vmatpush.bf16.msra.mxu2 %v3803_v11  ;;  %v3799_v7 = vld [vmem:[#allocation8 + $0x98] sm:$0xff] }
 0x1fa   : > { %v1625_v17 = vmax.f32 %v1609_v9, 0.0  ;;  %v1544_v22 = vadd.f32 %v1543_v1, %v1495_v15 }
 0x1fb   : > { %v3349_v40 = vld [vmem:[%s4889_s7 + $0x30] ss:$2 sm:$0xff]  ;;  %v4944_v26 = vld [vmem:[%s4889_s7 + $0x31] ss:$2 sm:$0xff] }
 0x1fc   : > { %1641 = vst [vmem:[%s4889_s7 + $0x40] sm:$0xff] %v1625_v17  ;;  %v1574_v29 = vmul.f32 %v4877_v10, %v1544_v22  ;;  %v1716_v30 = vpack.c.bf16 %v3349_v40, %v3348_v24  ;;  %v1692_v32 = vrot.slane %v4944_v26, 7  ;;  %v1717_v34 = vpack.c.bf16 %v4944_v26, %v4939_v16  ;;  %v3798_v24 = vld [vmem:[#allocation8 + $0x90] sm:$0xff]  ;;  %v3823_v26 = vld [vmem:[#allocation10 + $0x98] sm:$0xff] }
 0x1fd   : > { %1979 = vmatpush.bf16.msra.mxu2 %v3802_v54  ;;  %v3796_v54 = vld [vmem:[#allocation8 + $0x80] sm:$0xff]  ;;  %v3810_v16 = vld [vmem:[#allocation10 + $0x30] sm:$0xff] }
 0x1fe   : > { %v1594_v35 = vadd.f32 %v4882_v23, %v1574_v29  ;;  %1962 = vmatmul.bf16.gmra.mxu3 %v1716_v30  ;;  %v1693_v36 = vsel %vm761_vm0, %v1691_v27, %v1692_v32  ;;  %v1499_v37 = vpop.f32.mrf.mxu0 }
 0x1ff   : > { %v1448_v39 = vpop.f32.mrf.mxu3  ;;  %v3464_v44 = vpack.c.bf16 %v1693_v36, %v1691_v27  ;;  %2292 = vmatpush.bf16.msra.mxu3 %v3810_v16 }
 0x200   : > { %v1610_v45 = vadd.f32 %v1594_v35, %v4728_v12  ;;  %v1498_v46 = vadd.f32 %v1497_v20, %v1448_v39 }
 0x201   : > { %v1546_v18 = vpop.f32.mrf.mxu1  ;;  %3465 = vmatmul.msk.bf16.gmra.mxu2 %vm4651_vm4, %v3464_v44 }
 0x202   : > { %v1626_v47 = vmax.f32 %v1610_v45, 0.0  ;;  %v1547_v48 = vadd.f32 %v1546_v18, %v1498_v46  ;;  %1980 = vmatpush.bf16.msra.mxu2 %v3801_v62 }
 0x204   : > { %1642 = vst [vmem:[%s4889_s7 + $0x48] sm:$0xff] %v1626_v47  ;;  %v1575_v49 = vmul.f32 %v4877_v10, %v1547_v48  ;;  %v3797_v47 = vld [vmem:[#allocation8 + $0x88] sm:$0xff] }
 0x206   : > { %v1595_v55 = vadd.f32 %v4882_v23, %v1575_v49  ;;  %v1502_v12 = vpop.f32.mrf.mxu0  ;;  %1981 = vmatpush.bf16.msra.mxu2 %v3800_v5 }
 0x207   : > { %v1450_v56 = vpop.f32.mrf.mxu3 }
 0x208   : > { %v1611_v57 = vadd.f32 %v1595_v55, %v4731_v13  ;;  %v1500_v58 = vadd.f32 %v1499_v37, %v1450_v56 }
 0x209   : > { %v1548_v60 = vpop.f32.mrf.mxu1 }
 0x20a   : > { %v1627_v61 = vmax.f32 %v1611_v57, 0.0  ;;  %v1549_v52 = vadd.f32 %v1548_v60, %v1500_v58  ;;  %1982 = vmatpush.bf16.msra.mxu2 %v3799_v7  ;;  %v3826_v7 = vld [vmem:[#allocation10 + $0xb0] sm:$0xff] }
 0x20b   : > { %v4970_v9 = vld [vmem:[%s4889_s7 + $0x41] ss:$2 sm:$0xff]  ;;  %v3350_v22 = vld [vmem:[%s4889_s7 + $0x40] ss:$2 sm:$0xff] }
 0x20c   : > { %1643 = vst [vmem:[%s4889_s7 + $0x50] sm:$0xff] %v1627_v61  ;;  %v1576_v14 = vmul.f32 %v4877_v10, %v1549_v52  ;;  %v1694_v29 = vrot.slane %v4970_v9, 7 }
 0x20e   : > { %v1596_v63 = vadd.f32 %v4882_v23, %v1576_v14  ;;  %v1504_v4 = vpop.f32.mrf.mxu0  ;;  %1983 = vmatpush.bf16.msra.mxu2 %v3798_v24 }
 0x20f   : > { %v1453_v21 = vpop.f32.mrf.mxu3 }
 0x210   : > { %v1612_v0 = vadd.f32 %v1596_v63, %v4746_v28  ;;  %v1503_v19 = vadd.f32 %v1502_v12, %v1453_v21 }
 0x211   : > { %v1551_v2 = vpop.f32.mrf.mxu1 }
 0x212   : > { %v1628_v13 = vmax.f32 %v1612_v0, 0.0  ;;  %v1552_v3 = vadd.f32 %v1551_v2, %v1503_v19  ;;  %1984 = vmatpush.bf16.msra.mxu2 %v3797_v47 }
 0x214   : > { %1644 = vst [vmem:[%s4889_s7 + $0x58] sm:$0xff] %v1628_v13  ;;  %v1577_v53 = vmul.f32 %v4877_v10, %v1552_v3 }
 0x216   : > { %v1597_v6 = vadd.f32 %v4882_v23, %v1577_v53  ;;  %v1507_v35 = vpop.f32.mrf.mxu0  ;;  %1985 = vmatpush.bf16.msra.mxu2 %v3796_v54 }
 0x217   : > { %v1455_v20 = vpop.f32.mrf.mxu3 }
 0x218   : > { %v1613_v28 = vadd.f32 %v1597_v6, %v4759_v41  ;;  %v1505_v8 = vadd.f32 %v1504_v4, %v1455_v20  ;;  %v5016_v20 = vld [vmem:[#allocation10 + $0x68] sm:$0xff] }
 0x219   : > { %v1553_v15 = vpop.f32.mrf.mxu1 }
 0x21a   : > { %v1629_v1 = vmax.f32 %v1613_v28, 0.0  ;;  %v1554_v17 = vadd.f32 %v1553_v15, %v1505_v8  ;;  %v3825_v28 = vld [vmem:[#allocation10 + $0xa8] sm:$0xff]  ;;  %v5019_v8 = vld [vmem:[#allocation10 + $0x60] sm:$0xff]  ;;  %2478 = vmatpush.bf16.msrb.mxu2 %v3811_v31  ;;  %v3814_v15 = vld [vmem:[#allocation10 + $0x50] sm:$0xff] }
 0x21b   : > { %v3351_v40 = vld [vmem:[%s4889_s7 + $0x50] ss:$2 sm:$0xff]  ;;  %v4975_v27 = vld [vmem:[%s4889_s7 + $0x51] ss:$2 sm:$0xff] }
 0x21c   : > { %1645 = vst [vmem:[%s4889_s7 + $0x60] sm:$0xff] %v1629_v1  ;;  %v1578_v30 = vmul.f32 %v4877_v10, %v1554_v17  ;;  %v1719_v32 = vpack.c.bf16 %v3351_v40, %v3350_v22  ;;  %v1695_v41 = vrot.slane %v4975_v27, 7  ;;  %v1720_v11 = vpack.c.bf16 %v4975_v27, %v4970_v9  ;;  %v3809_v9 = vld [vmem:[#allocation10 + $0x28] sm:$0xff]  ;;  %v3822_v1 = vld [vmem:[#allocation10 + $0x90] sm:$0xff]  ;;  %v3808_v17 = vld [vmem:[#allocation10 + $0x20] sm:$0xff] }
 0x21d   : > { %2293 = vmatpush.bf16.msra.mxu3 %v3809_v9  ;;  %v3807_v40 = vld [vmem:[#allocation10 + $0x18] sm:$0xff] }
 0x21e   : > { %v1598_v36 = vadd.f32 %v4882_v23, %v1578_v30  ;;  %1967 = vmatmul.bf16.gmra.mxu3 %v1719_v32  ;;  %v1696_v37 = vsel %vm761_vm0, %v1694_v29, %v1695_v41  ;;  %2479 = vmatpush.bf16.msrb.mxu2 %v3810_v16  ;;  %v3806_v30 = vld [vmem:[#allocation10 + $0x10] sm:$0xff]  ;;  %v3821_v32 = vld [vmem:[#allocation10 + $0x88] sm:$0xff] }
 0x21f   : > { %v1458_v39 = vpop.f32.mrf.mxu3  ;;  %v3468_v44 = vpack.c.bf16 %v1696_v37, %v1694_v29  ;;  %v3813_v29 = vld [vmem:[#allocation10 + $0x48] sm:$0xff]  ;;  %v3804_v37 = vld [vmem:[#allocation10] sm:$0xff] }
 0x220   : > { %v1614_v45 = vadd.f32 %v1598_v36, %v4762_v42  ;;  %v1508_v46 = vadd.f32 %v1507_v35, %v1458_v39  ;;  %v1509_v42 = vpop.f32.mrf.mxu0  ;;  %v3812_v36 = vld [vmem:[#allocation10 + $0x40] sm:$0xff] }
 0x221   : > { %v1556_v18 = vpop.f32.mrf.mxu1  ;;  %3469 = vmatmul.msk.bf16.gmra.mxu2 %vm4651_vm4, %v3468_v44  ;;  %2294 = vmatpush.bf16.msra.mxu3 %v3808_v17  ;;  %v3820_v39 = vld [vmem:[#allocation10 + $0x80] sm:$0xff] }
 0x222   : > { %v1630_v48 = vmax.f32 %v1614_v45, 0.0  ;;  %v1557_v49 = vadd.f32 %v1556_v18, %v1508_v46  ;;  %2480 = vmatpush.bf16.msrb.mxu2 %v3809_v9  ;;  %v5035_v46 = vld [vmem:[%s5342_s8] ss:$0 sm:$0xff] }
 0x224   : > { %1646 = vst [vmem:[%s4889_s7 + $0x68] sm:$0xff] %v1630_v48  ;;  %v1579_v55 = vmul.f32 %v4877_v10, %v1557_v49 }
 0x225   : > { %2295 = vmatpush.bf16.msra.mxu3 %v3807_v40 }
 0x226   : > { %v1599_v56 = vadd.f32 %v4882_v23, %v1579_v55  ;;  %2481 = vmatpush.bf16.msrb.mxu2 %v3808_v17 }
 0x227   : > { %v1460_v57 = vpop.f32.mrf.mxu3 }
 0x228   : > { %v1615_v58 = vadd.f32 %v1599_v56, %v4765_v43  ;;  %v1510_v12 = vadd.f32 %v1509_v42, %v1460_v57  ;;  %v2015_v57 = vld [vmem:[%s4564_s16] sm:$0xff] }
 0x229   : > { %v1558_v60 = vpop.f32.mrf.mxu1  ;;  %2296 = vmatpush.bf16.msra.mxu3 %v3806_v30 }
 0x22a   : > { %v1631_v61 = vmax.f32 %v1615_v58, 0.0  ;;  %v1559_v52 = vadd.f32 %v1558_v60, %v1510_v12  ;;  %2482 = vmatpush.bf16.msrb.mxu2 %v3807_v40 }
 0x22b   : > { %v3360_v0 = vld [vmem:[%s4889_s7 + $0x61] ss:$2 sm:$0xff]  ;;  %v3352_v19 = vld [vmem:[%s4889_s7 + $0x60] ss:$2 sm:$0xff] }
 0x22c   : > { %1647 = vst [vmem:[%s4889_s7 + $0x70] sm:$0xff] %v1631_v61  ;;  %v1580_v14 = vmul.f32 %v4877_v10, %v1559_v52  ;;  %v1697_v4 = vrot.slane %v3360_v0, 7  ;;  %v5004_v10 = vld [vmem:[#allocation10 + $0x78] sm:$0xff] }
 0x22d   : > { %2320 = vmatpush.bf16.msra.mxu0 %v5004_v10 }
 0x22e   : > { %v1600_v62 = vadd.f32 %v4882_v23, %v1580_v14  ;;  %v5010_v23 = vld [vmem:[#allocation10 + $0x70] sm:$0xff]  ;;  %2483 = vmatpush.bf16.msrb.mxu2 %v3806_v30  ;;  %v2016_v14 = vld [vmem:[%s4564_s16 + $0x8] sm:$0xff] }
 0x230   : > { %v1616_v63 = vadd.f32 %v1600_v62, %v4780_v59  ;;  %v3827_v59 = vld [vmem:[#allocation10 + $0xb8] sm:$0xff] }
 0x231   : > { %2349 = vmatpush.bf16.msra.mxu1 %v3827_v59  ;;  %2321 = vmatpush.bf16.msra.mxu0 %v5010_v23 }
 0x232   : > { %v1632_v21 = vmax.f32 %v1616_v63, 0.0 }
 0x234   : > { %1648 = vst [vmem:[%s4889_s7 + $0x78] sm:$0xff] %v1632_v21 }
 0x235   : > { %2350 = vmatpush.bf16.msra.mxu1 %v3826_v7  ;;  %2322 = vmatpush.bf16.msra.mxu0 %v5016_v20 }
 0x239   : > { %2351 = vmatpush.bf16.msra.mxu1 %v3825_v28  ;;  %2323 = vmatpush.bf16.msra.mxu0 %v5019_v8 }
 0x23b   : > { %v3353_v2 = vld [vmem:[%s4889_s7 + $0x70] ss:$2 sm:$0xff]  ;;  %v3361_v13 = vld [vmem:[%s4889_s7 + $0x71] ss:$2 sm:$0xff] }
 0x23c   : > { %v1722_v3 = vpack.c.bf16 %v3353_v2, %v3352_v19  ;;  %v1698_v43 = vrot.slane %v3361_v13, 7  ;;  %v1723_v53 = vpack.c.bf16 %v3361_v13, %v3360_v0 }
 0x23d   : > { %2352 = vmatpush.bf16.msra.mxu1 %v3824_v25 }
 0x23e   : > { %1972 = vmatmul.bf16.gmra.mxu3 %v1722_v3  ;;  %v1699_v5 = vsel %vm761_vm0, %v1697_v4, %v1698_v43 }
 0x23f   : > { %v3472_v6 = vpack.c.bf16 %v1699_v5, %v1697_v4 }
 0x241   : > { %3473 = vmatmul.msk.bf16.gmra.mxu2 %vm4651_vm4, %v3472_v6  ;;  %2353 = vmatpush.bf16.msra.mxu1 %v3823_v26 }
 0x245   : > { %2354 = vmatpush.bf16.msra.mxu1 %v3822_v1 }
 0x249   : > { %2355 = vmatpush.bf16.msra.mxu1 %v3821_v32 }
 0x24d   : > { %2356 = vmatpush.bf16.msra.mxu1 %v3820_v39 }
 0x251   : > { %1986 = vmatmul.bf16.vlgmr.msra.gmra.mxu2 %v1714_v51  ;;  %v3815_v51 = vld [vmem:[#allocation10 + $0x58] sm:$0xff] }
 0x252   : > { %2324 = vmatpush.bf16.msra.mxu0 %v3815_v51 }
 0x256   : > { %2325 = vmatpush.bf16.msra.mxu0 %v3814_v15 }
 0x25a   : > { %2326 = vmatpush.bf16.msra.mxu0 %v3813_v29 }
 0x25e   : > { %2327 = vmatpush.bf16.msra.mxu0 %v3812_v36 }
 0x261   : > { %1991 = vmatmul.bf16.gmra.mxu2 %v1717_v34  ;;  %v1958_v45 = vpop.f32.mrf.mxu3 }
 0x262   : > { %2536 = vmatpush.bf16.msrb.mxu0 %v3827_v59 }
 0x264   : > { %v1929_v34 = vpop.f32.mrf.mxu2 }
 0x265   : > { %v1930_v47 = vadd.f32 %v5035_v46, %v1929_v34 }
 0x266   : > { %2537 = vmatpush.bf16.msrb.mxu0 %v3826_v7 }
 0x267   : > { %v1959_v49 = vadd.f32 %v1958_v45, %v1930_v47  ;;  %v2019_v47 = vld [vmem:[%s4564_s16 + $0x20] sm:$0xff] }
 0x269   : > { %v1960_v48 = vpop.f32.mrf.mxu3 }
 0x26a   : > { %2538 = vmatpush.bf16.msrb.mxu0 %v3825_v28  ;;  %v2017_v28 = vld [vmem:[%s4564_s16 + $0x10] sm:$0xff] }
 0x26c   : > { %v1931_v22 = vpop.f32.mrf.mxu2 }
 0x26d   : > { %v1932_v56 = vadd.f32 %v5035_v46, %v1931_v22 }
 0x26e   : > { %2539 = vmatpush.bf16.msrb.mxu0 %v3824_v25 }
 0x26f   : > { %v1961_v58 = vadd.f32 %v1960_v48, %v1932_v56  ;;  %v2020_v56 = vld [vmem:[%s4564_s16 + $0x28] sm:$0xff] }
 0x271   : > { %1996 = vmatmul.bf16.gmra.mxu2 %v1720_v11  ;;  %v3805_v11 = vld [vmem:[#allocation10 + $0x8] sm:$0xff] }
 0x272   : > { %2297 = vmatpush.bf16.msra.mxu3 %v3805_v11  ;;  %2484 = vmatpush.bf16.msrb.mxu2 %v3805_v11 }
 0x273   : > { %2540 = vmatpush.bf16.msrb.mxu0 %v3823_v26  ;;  %v2018_v26 = vld [vmem:[%s4564_s16 + $0x18] sm:$0xff] }
 0x276   : > { %2298 = vmatpush.bf16.msra.mxu3 %v3804_v37  ;;  %2485 = vmatpush.bf16.msrb.mxu2 %v3804_v37 }
 0x277   : > { %2541 = vmatpush.bf16.msrb.mxu0 %v3822_v1 }
 0x27a   : > { %2507 = vmatpush.bf16.msrb.mxu3 %v5004_v10 }
 0x27b   : > { %2542 = vmatpush.bf16.msrb.mxu0 %v3821_v32 }
 0x27e   : > { %2508 = vmatpush.bf16.msrb.mxu3 %v5010_v23 }
 0x27f   : > { %2543 = vmatpush.bf16.msrb.mxu0 %v3820_v39 }
 0x281   : > { %2001 = vmatmul.bf16.gmra.mxu2 %v1723_v53  ;;  %v1963_v12 = vpop.f32.mrf.mxu3 }
 0x282   : > { %2509 = vmatpush.bf16.msrb.mxu3 %v5016_v20 }
 0x284   : > { %v1934_v24 = vpop.f32.mrf.mxu2 }
 0x285   : > { %v1935_v63 = vadd.f32 %v5035_v46, %v1934_v24 }
 0x286   : > { %2510 = vmatpush.bf16.msrb.mxu3 %v5019_v8 }
 0x287   : > { %v1964_v4 = vadd.f32 %v1963_v12, %v1935_v63 }
 0x289   : > { %v1965_v6 = vpop.f32.mrf.mxu3 }
 0x28a   : > { %2511 = vmatpush.bf16.msrb.mxu3 %v3815_v51 }
 0x28c   : > { %v5022_v27 = vpop.f32.mrf.mxu2 }
 0x28d   : > { %v1937_v7 = vadd.f32 %v5035_v46, %v5022_v27 }
 0x28e   : > { %2512 = vmatpush.bf16.msrb.mxu3 %v3814_v15 }
 0x28f   : > { %v1966_v8 = vadd.f32 %v1965_v6, %v1937_v7  ;;  %v2022_v7 = vld [vmem:[%s4564_s16 + $0x38] sm:$0xff] }
 0x292   : > { %2513 = vmatpush.bf16.msrb.mxu3 %v3813_v29 }
 0x296   : > { %2514 = vmatpush.bf16.msrb.mxu3 %v3812_v36 }
 0x2a1   : > { %v1968_v51 = vpop.f32.mrf.mxu3 }
 0x2a4   : > { %v5024_v41 = vpop.f32.mrf.mxu2 }
 0x2a5   : > { %v1940_v9 = vadd.f32 %v5035_v46, %v5024_v41 }
 0x2a7   : > { %v1969_v27 = vadd.f32 %v1968_v51, %v1940_v9 }
 0x2a9   : > { %v1970_v39 = vpop.f32.mrf.mxu3 }
 0x2ac   : > { %v5026_v35 = vpop.f32.mrf.mxu2 }
 0x2ad   : > { %v1942_v37 = vadd.f32 %v5035_v46, %v5026_v35 }
 0x2af   : > { %v1971_v48 = vadd.f32 %v1970_v39, %v1942_v37 }
 0x2c4   : > { %v5028_v44 = vpop.f32.mrf.mxu2 }
 0x2c5   : > { %v1945_v35 = vadd.f32 %v5035_v46, %v5028_v44 }
 0x2cc   : > { %v5037_v18 = vpop.f32.mrf.mxu2 }
 0x2d4   : > { %v1987_v54 = vpop.f32.mrf.mxu2 }
 0x2d5   : > { %v1988_v55 = vadd.f32 %v1987_v54, %v1959_v49 }
 0x2d7   : > { %v2007_v42 = vmax.f32 %v1988_v55, 0.0 }
 0x2d9   : > { %v5044_v52 = vadd.f32 %v2015_v57, %v2007_v42  ;;  %v1973_v57 = vpop.f32.mrf.mxu3 }
 0x2da   : > { %v1974_v63 = vadd.f32 %v1973_v57, %v1945_v35 }
 0x2db   : > { %v2039_v0 = vrot.slane %v5044_v52, 7  ;;  %v2063_v19 = vrot.slane %v5044_v52, 1 }
 0x2dc   : > { %v1989_v60 = vpop.f32.mrf.mxu2 }
 0x2dd   : > { %v1990_v61 = vadd.f32 %v1989_v60, %v1961_v58 }
 0x2df   : > { %v2008_v62 = vmax.f32 %v1990_v61, 0.0 }
 0x2e1   : > { %v5048_v21 = vadd.f32 %v2016_v14, %v2008_v62 }
 0x2e3   : > { %v2040_v2 = vrot.slane %v5048_v21, 7  ;;  %v2064_v13 = vrot.slane %v5048_v21, 1  ;;  %v2088_v3 = vpack.c.bf16 %v5048_v21, %v5044_v52 }
 0x2e4   : > { %v1992_v43 = vpop.f32.mrf.mxu2 }
 0x2e5   : > { %v2041_v53 = vsel %vm761_vm0, %v2039_v0, %v2040_v2  ;;  %v2065_v5 = vsel %vm810_vm1, %v2063_v19, %v2064_v13  ;;  %2328 = vmatmul.bf16.vlgmr.msra.gmra.mxu0 %v2088_v3  ;;  %v1993_v23 = vadd.f32 %v1992_v43, %v1964_v4  ;;  %v1947_v4 = vadd.f32 %v5035_v46, %v5037_v18  ;;  %v1975_v43 = vpop.f32.mrf.mxu3 }
 0x2e6   : > { %v3572_v10 = vpack.c.bf16 %v2041_v53, %v2039_v0  ;;  %v3587_v59 = vpack.c.bf16 %v2064_v13, %v2065_v5  ;;  %v2021_v5 = vld [vmem:[%s4564_s16 + $0x30] sm:$0xff] }
 0x2e7   : > { %v2009_v20 = vmax.f32 %v1993_v23, 0.0  ;;  %v1976_v6 = vadd.f32 %v1975_v43, %v1947_v4 }
 0x2e8   : > { %3573 = vmatmul.msk.bf16.vlgmr.msra.gmra.mxu3 %vm4651_vm4, %v3572_v10  ;;  %3588 = vmatmul.msk.bf16.vlgmr.msra.gmra.mxu1 %vm4678_vm5, %v3587_v59 }
 0x2e9   : > { %v5065_v16 = vadd.f32 %v2017_v28, %v2009_v20 }
 0x2eb   : > { %v2066_v1 = vrot.slane %v5065_v16, 1  ;;  %v2042_v24 = vrot.slane %v5065_v16, 7 }
 0x2ec   : > { %v1994_v25 = vpop.f32.mrf.mxu2 }
 0x2ed   : > { %v1995_v31 = vadd.f32 %v1994_v25, %v1966_v8 }
 0x2ef   : > { %v2010_v34 = vmax.f32 %v1995_v31, 0.0 }
 0x2f1   : > { %v5070_v15 = vadd.f32 %v2018_v26, %v2010_v34 }
 0x2f3   : > { %v2043_v17 = vrot.slane %v5070_v15, 7  ;;  %v2091_v22 = vpack.c.bf16 %v5070_v15, %v5065_v16  ;;  %v2067_v40 = vrot.slane %v5070_v15, 1 }
 0x2f4   : > { %v1997_v29 = vpop.f32.mrf.mxu2 }
 0x2f5   : > { %2333 = vmatmul.bf16.gmra.mxu0 %v2091_v22  ;;  %v2044_v30 = vsel %vm761_vm0, %v2042_v24, %v2043_v17  ;;  %v2068_v32 = vsel %vm810_vm1, %v2066_v1, %v2067_v40  ;;  %v1998_v41 = vadd.f32 %v1997_v29, %v1969_v27  ;;  %v5129_v27 = vld [vmem:[%s5344_s10] ss:$0 sm:$0xff] }
 0x2f6   : > { %v3576_v11 = vpack.c.bf16 %v2044_v30, %v2042_v24  ;;  %v3590_v36 = vpack.c.bf16 %v2067_v40, %v2068_v32 }
 0x2f7   : > { %v2011_v45 = vmax.f32 %v1998_v41, 0.0  ;;  %v5135_v41 = vld [vmem:[%s5406_s25] ss:$0 sm:$0xff]  ;;  %s4170_s25 = sshra.s32 %s2956_s22, 4  ;;  %s4171_s25 = int_to_ptr.hbm [resolvable:$true] %s4170_s25 }
 0x2f8   : > { %3577 = vmatmul.msk.bf16.gmra.mxu3 %vm4651_vm4, %v3576_v11  ;;  %3591 = vmatmul.msk.bf16.gmra.mxu1 %vm4678_vm5, %v3590_v36  ;;  %s4172_s18 = scalar_lea.hbm %s4171_s25, 64  ;;  %p4177_p2 = scmp.lt.s32.totalorder %s4171_s25, %s5410_s14 }
 0x2f9   : > { %v5087_v55 = vadd.f32 %v2019_v47, %v2011_v45  ;;  %p4173_p1 = scmp.ne.s32.totalorder %s4171_s25, %s4172_s18  ;;  %p4178_p10 = scmp.lt.s32.totalorder %s4176_s27, %s4172_s18 }
 0x2fb   : > { %v2069_v12 = vrot.slane %v5087_v55, 1  ;;  %v2045_v14 = vrot.slane %v5087_v55, 7  ;;  %p4174_p4 = pnand %p4173_p1, %p4492_p3  ;;  %p4179_p11 = por %p4178_p10, %p4177_p2 }
 0x2fc   : > { %v1999_v49 = vpop.f32.mrf.mxu2 }
 0x2fd   : > { %v2000_v54 = vadd.f32 %v1999_v49, %v1971_v48  ;;  %p4175_p8 = pneg %p4174_p4 }
 0x2ff   : > { %v2012_v42 = vmax.f32 %v2000_v54, 0.0  ;;  %p4180_p9 = pnand %p4179_p11, %p4175_p8 }
 0x301   : > { %v5092_v58 = vadd.f32 %v2020_v56, %v2012_v42 }
 0x303   : > { %v2046_v60 = vrot.slane %v5092_v58, 7  ;;  %v2094_v61 = vpack.c.bf16 %v5092_v58, %v5087_v55  ;;  %v2070_v62 = vrot.slane %v5092_v58, 1 }
 0x304   : > { %v2002_v0 = vpop.f32.mrf.mxu2 }
 0x305   : > { %2338 = vmatmul.bf16.gmra.mxu0 %v2094_v61  ;;  %v2047_v44 = vsel %vm761_vm0, %v2045_v14, %v2046_v60  ;;  %v2071_v19 = vsel %vm810_vm1, %v2069_v12, %v2070_v62  ;;  %v2003_v2 = vadd.f32 %v2002_v0, %v1974_v63 }
 0x306   : > { %v3580_v13 = vpack.c.bf16 %v2047_v44, %v2045_v14  ;;  %v3593_v3 = vpack.c.bf16 %v2070_v62, %v2071_v19 }
 0x307   : > { %v2013_v53 = vmax.f32 %v2003_v2, 0.0 }
 0x308   : > { %3581 = vmatmul.msk.bf16.gmra.mxu3 %vm4651_vm4, %v3580_v13  ;;  %3594 = vmatmul.msk.bf16.gmra.mxu1 %vm4678_vm5, %v3593_v3 }
 0x309   : > { %v5109_v23 = vadd.f32 %v2021_v5, %v2013_v53 }
 0x30b   : > { %v2072_v46 = vrot.slane %v5109_v23, 1  ;;  %v2048_v25 = vrot.slane %v5109_v23, 7 }
 0x30c   : > { %v2004_v10 = vpop.f32.mrf.mxu2 }
 0x30d   : > { %v2005_v59 = vadd.f32 %v2004_v10, %v1976_v6 }
 0x30f   : > { %v2014_v20 = vmax.f32 %v2005_v59, 0.0 }
 0x311   : > { %v5112_v28 = vadd.f32 %v2022_v7, %v2014_v20 }
 0x313   : > { %v2049_v18 = vrot.slane %v5112_v28, 7  ;;  %v2097_v8 = vpack.c.bf16 %v5112_v28, %v5109_v23  ;;  %v2073_v31 = vrot.slane %v5112_v28, 1 }
 0x315   : > { %2343 = vmatmul.bf16.gmra.mxu0 %v2097_v8  ;;  %v2050_v51 = vsel %vm761_vm0, %v2048_v25, %v2049_v18  ;;  %v2074_v26 = vsel %vm810_vm1, %v2072_v46, %v2073_v31 }
 0x316   : > { %v3584_v34 = vpack.c.bf16 %v2050_v51, %v2048_v25  ;;  %v3596_v9 = vpack.c.bf16 %v2073_v31, %v2074_v26 }
 0x318   : > { %3585 = vmatmul.msk.bf16.gmra.mxu3 %vm4651_vm4, %v3584_v34  ;;  %3597 = vmatmul.msk.bf16.gmra.mxu1 %vm4678_vm5, %v3596_v9 }
 0x362   : > { %v2329_v1 = vpop.f32.mrf.mxu0 }
 0x365   : > { %v2358_v17 = vpop.f32.mrf.mxu1 }
 0x36a   : > { %v2331_v22 = vpop.f32.mrf.mxu0 }
 0x36b   : > { %v2300_v24 = vpop.f32.mrf.mxu3 }
 0x36c   : > { %v2330_v40 = vadd.f32 %v2329_v1, %v2300_v24 }
 0x36d   : > { %v2360_v29 = vpop.f32.mrf.mxu1 }
 0x36e   : > { %v2359_v30 = vadd.f32 %v2358_v17, %v2330_v40 }
 0x370   : > { %v2382_v32 = vmul.f32 %v5129_v27, %v2359_v30 }
 0x372   : > { %v2334_v11 = vpop.f32.mrf.mxu0  ;;  %v2394_v39 = vadd.f32 %v5135_v41, %v2382_v32 }
 0x373   : > { %v2302_v36 = vpop.f32.mrf.mxu3 }
 0x374   : > { %v2332_v37 = vadd.f32 %v2331_v22, %v2302_v36  ;;  %v2402_v49 = vmax.f32 %v2394_v39, 0.0 }
 0x375   : > { %v2363_v45 = vpop.f32.mrf.mxu1 }
 0x376   : > { %v2361_v47 = vadd.f32 %v2360_v29, %v2332_v37  ;;  %v2418_v12 = vrot.slane %v2402_v49, 7  ;;  %v2442_v60 = vrot.slane %v2402_v49, 1 }
 0x378   : > { %v2383_v48 = vmul.f32 %v5129_v27, %v2361_v47 }
 0x37a   : > { %v2395_v54 = vadd.f32 %v5135_v41, %v2383_v48  ;;  %v2336_v56 = vpop.f32.mrf.mxu0 }
 0x37b   : > { %v2305_v42 = vpop.f32.mrf.mxu3 }
 0x37c   : > { %v2403_v57 = vmax.f32 %v2395_v54, 0.0  ;;  %v2335_v35 = vadd.f32 %v2334_v11, %v2305_v42 }
 0x37d   : > { %v2365_v61 = vpop.f32.mrf.mxu1 }
 0x37e   : > { %v2419_v14 = vrot.slane %v2403_v57, 7  ;;  %v2443_v62 = vrot.slane %v2403_v57, 1  ;;  %v2467_v63 = vpack.c.bf16 %v2403_v57, %v2402_v49  ;;  %v2364_v0 = vadd.f32 %v2363_v45, %v2335_v35 }
 0x380   : > { %v2420_v44 = vsel %vm761_vm0, %v2418_v12, %v2419_v14  ;;  %v2444_v19 = vsel %vm810_vm1, %v2442_v60, %v2443_v62  ;;  %2515 = vmatmul.bf16.vlgmr.msrb.gmra.mxu3 %v2467_v63  ;;  %v2384_v3 = vmul.f32 %v5129_v27, %v2364_v0 }
 0x381   : > { %v3600_v2 = vpack.c.bf16 %v2420_v44, %v2418_v12  ;;  %v3615_v13 = vpack.c.bf16 %v2443_v62, %v2444_v19 }
 0x382   : > { %v2396_v53 = vadd.f32 %v5135_v41, %v2384_v3  ;;  %v2339_v5 = vpop.f32.mrf.mxu0 }
 0x383   : > { %v2307_v4 = vpop.f32.mrf.mxu3  ;;  %3601 = vmatmul.msk.bf16.vlgmr.msrb.gmra.mxu2 %vm4651_vm4, %v3600_v2  ;;  %3616 = vmatmul.msk.bf16.vlgmr.msrb.gmra.mxu0 %vm4678_vm5, %v3615_v13 }
 0x384   : > { %v2337_v43 = vadd.f32 %v2336_v56, %v2307_v4  ;;  %v2404_v7 = vmax.f32 %v2396_v53, 0.0 }
 0x385   : > { %v2368_v10 = vpop.f32.mrf.mxu1 }
 0x386   : > { %v2366_v6 = vadd.f32 %v2365_v61, %v2337_v43  ;;  %v2445_v25 = vrot.slane %v2404_v7, 1  ;;  %v2421_v31 = vrot.slane %v2404_v7, 7 }
 0x388   : > { %v2385_v59 = vmul.f32 %v5129_v27, %v2366_v6 }
 0x38a   : > { %v2397_v20 = vadd.f32 %v5135_v41, %v2385_v59  ;;  %v2341_v1 = vpop.f32.mrf.mxu0 }
 0x38b   : > { %v2310_v46 = vpop.f32.mrf.mxu3 }
 0x38c   : > { %v2405_v18 = vmax.f32 %v2397_v20, 0.0  ;;  %v2340_v8 = vadd.f32 %v2339_v5, %v2310_v46 }
 0x38d   : > { %v2370_v40 = vpop.f32.mrf.mxu1 }
 0x38e   : > { %v2422_v51 = vrot.slane %v2405_v18, 7  ;;  %v2369_v26 = vadd.f32 %v2368_v10, %v2340_v8  ;;  %v2470_v34 = vpack.c.bf16 %v2405_v18, %v2404_v7  ;;  %v2446_v9 = vrot.slane %v2405_v18, 1 }
 0x390   : > { %2520 = vmatmul.bf16.gmra.mxu3 %v2470_v34  ;;  %v2423_v17 = vsel %vm761_vm0, %v2421_v31, %v2422_v51  ;;  %v2447_v22 = vsel %vm810_vm1, %v2445_v25, %v2446_v9  ;;  %v2386_v24 = vmul.f32 %v5129_v27, %v2369_v26  ;;  %v3835_v34 = vld [vmem:[#allocation11 + $0x38] sm:$0xff] }
 0x391   : > { %v3604_v29 = vpack.c.bf16 %v2423_v17, %v2421_v31  ;;  %v3618_v30 = vpack.c.bf16 %v2446_v9, %v2447_v22  ;;  %v3842_v9 = vld [vmem:[#allocation11 + $0x70] sm:$0xff]  ;;  %2846 = vmatpush.bf16.msrb.mxu1 %v3835_v34  ;;  %v3841_v22 = vld [vmem:[#allocation11 + $0x68] sm:$0xff] }
 0x392   : > { %v2398_v36 = vadd.f32 %v5135_v41, %v2386_v24  ;;  %v2344_v47 = vpop.f32.mrf.mxu0  ;;  %v3834_v17 = vld [vmem:[#allocation11 + $0x30] sm:$0xff]  ;;  %v3849_v24 = vld [vmem:[#allocation11 + $0xa8] sm:$0xff] }
 0x393   : > { %v2312_v32 = vpop.f32.mrf.mxu3  ;;  %3605 = vmatmul.msk.bf16.gmra.mxu2 %vm4651_vm4, %v3604_v29  ;;  %3619 = vmatmul.msk.bf16.gmra.mxu0 %vm4678_vm5, %v3618_v30  ;;  %v3848_v29 = vld [vmem:[#allocation11 + $0xa0] sm:$0xff] }
 0x394   : > { %v2342_v11 = vadd.f32 %v2341_v1, %v2312_v32  ;;  %v2406_v45 = vmax.f32 %v2398_v36, 0.0  ;;  %v3850_v1 = vld [vmem:[#allocation11 + $0xb0] sm:$0xff]  ;;  %v3832_v30 = vld [vmem:[#allocation11 + $0x20] sm:$0xff]  ;;  %v3847_v36 = vld [vmem:[#allocation11 + $0x98] sm:$0xff] }
 0x395   : > { %v2373_v49 = vpop.f32.mrf.mxu1  ;;  %2847 = vmatpush.bf16.msrb.mxu1 %v3834_v17 }
 0x396   : > { %v2371_v37 = vadd.f32 %v2370_v40, %v2342_v11  ;;  %v2448_v57 = vrot.slane %v2406_v45, 1  ;;  %v2424_v35 = vrot.slane %v2406_v45, 7  ;;  %v3839_v11 = vld [vmem:[#allocation11 + $0x58] sm:$0xff] }
 0x398   : > { %v2387_v39 = vmul.f32 %v5129_v27, %v2371_v37 }
 0x399   : > { %2848 = vmatpush.bf16.msrb.mxu1 %v3833_v38 }
 0x39a   : > { %v2399_v48 = vadd.f32 %v5135_v41, %v2387_v39  ;;  %v2346_v2 = vpop.f32.mrf.mxu0  ;;  %v3831_v39 = vld [vmem:[#allocation11 + $0x18] sm:$0xff] }
 0x39b   : > { %v2315_v54 = vpop.f32.mrf.mxu3 }
 0x39c   : > { %v2407_v56 = vmax.f32 %v2399_v48, 0.0  ;;  %v2345_v42 = vadd.f32 %v2344_v47, %v2315_v54  ;;  %v5179_v47 = vld [vmem:[%s5407_s1] ss:$0 sm:$0xff]  ;;  %v3846_v54 = vld [vmem:[#allocation11 + $0x90] sm:$0xff] }
 0x39d   : > { %v2375_v43 = vpop.f32.mrf.mxu1  ;;  %2849 = vmatpush.bf16.msrb.mxu1 %v3832_v30 }
 0x39e   : > { %v2425_v12 = vrot.slane %v2407_v56, 7  ;;  %v2374_v60 = vadd.f32 %v2373_v49, %v2345_v42  ;;  %v2473_v61 = vpack.c.bf16 %v2407_v56, %v2406_v45  ;;  %v2449_v14 = vrot.slane %v2407_v56, 1  ;;  %v3838_v49 = vld [vmem:[#allocation11 + $0x50] sm:$0xff]  ;;  %v5184_v42 = vld [vmem:[%s5408_s26] ss:$0 sm:$0xff] }
 0x3a0   : > { %2525 = vmatmul.bf16.gmra.mxu3 %v2473_v61  ;;  %v2426_v62 = vsel %vm761_vm0, %v2424_v35, %v2425_v12  ;;  %v2450_v63 = vsel %vm810_vm1, %v2448_v57, %v2449_v14  ;;  %v2388_v0 = vmul.f32 %v5129_v27, %v2374_v60  ;;  %v3830_v57 = vld [vmem:[#allocation11 + $0x10] sm:$0xff]  ;;  %v3837_v60 = vld [vmem:[#allocation11 + $0x48] sm:$0xff] }
 0x3a1   : > { %v3608_v44 = vpack.c.bf16 %v2426_v62, %v2424_v35  ;;  %v3621_v19 = vpack.c.bf16 %v2449_v14, %v2450_v63  ;;  %2850 = vmatpush.bf16.msrb.mxu1 %v3831_v39  ;;  %v3845_v61 = vld [vmem:[#allocation11 + $0x88] sm:$0xff] }
 0x3a2   : > { %v2400_v4 = vadd.f32 %v5135_v41, %v2388_v0  ;;  %v3829_v63 = vld [vmem:[#allocation11 + $0x8] sm:$0xff] }
 0x3a3   : > { %v2317_v13 = vpop.f32.mrf.mxu3  ;;  %3609 = vmatmul.msk.bf16.gmra.mxu2 %vm4651_vm4, %v3608_v44  ;;  %3622 = vmatmul.msk.bf16.gmra.mxu0 %vm4678_vm5, %v3621_v19 }
 0x3a4   : > { %v2347_v3 = vadd.f32 %v2346_v2, %v2317_v13  ;;  %v2408_v6 = vmax.f32 %v2400_v4, 0.0  ;;  %v3836_v2 = vld [vmem:[#allocation11 + $0x40] sm:$0xff] }
 0x3a5   : > { %2851 = vmatpush.bf16.msrb.mxu1 %v3830_v57  ;;  %v3844_v13 = vld [vmem:[#allocation11 + $0x80] sm:$0xff] }
 0x3a6   : > { %v2376_v53 = vadd.f32 %v2375_v43, %v2347_v3  ;;  %v2451_v7 = vrot.slane %v2408_v6, 1  ;;  %v2427_v18 = vrot.slane %v2408_v6, 7  ;;  %v3828_v43 = vld [vmem:[#allocation11] sm:$0xff] }
 0x3a8   : > { %v2389_v5 = vmul.f32 %v5129_v27, %v2376_v53  ;;  %v3843_v27 = vld [vmem:[#allocation11 + $0x78] sm:$0xff] }
 0x3a9   : > { %2865 = vmatpush.bf16.msra.mxu2 %v3843_v27  ;;  %2852 = vmatpush.bf16.msrb.mxu1 %v3829_v63 }
 0x3aa   : > { %v2401_v10 = vadd.f32 %v5135_v41, %v2389_v5  ;;  %v3851_v41 = vld [vmem:[#allocation11 + $0xb8] sm:$0xff] }
 0x3ab   : > { %2884 = vmatpush.bf16.msra.mxu3 %v3851_v41 }
 0x3ac   : > { %v2409_v59 = vmax.f32 %v2401_v10, 0.0 }
 0x3ad   : > { %2866 = vmatpush.bf16.msra.mxu2 %v3842_v9  ;;  %2853 = vmatpush.bf16.msrb.mxu1 %v3828_v43 }
 0x3ae   : > { %v2428_v20 = vrot.slane %v2409_v59, 7  ;;  %v2476_v46 = vpack.c.bf16 %v2409_v59, %v2408_v6  ;;  %v2452_v8 = vrot.slane %v2409_v59, 1 }
 0x3af   : > { %2885 = vmatpush.bf16.msra.mxu3 %v3850_v1 }
 0x3b0   : > { %2530 = vmatmul.bf16.gmra.mxu3 %v2476_v46  ;;  %v2429_v25 = vsel %vm761_vm0, %v2427_v18, %v2428_v20  ;;  %v2453_v31 = vsel %vm810_vm1, %v2451_v7, %v2452_v8 }
 0x3b1   : > { %v3612_v51 = vpack.c.bf16 %v2429_v25, %v2427_v18  ;;  %v3624_v26 = vpack.c.bf16 %v2452_v8, %v2453_v31  ;;  %2867 = vmatpush.bf16.msra.mxu2 %v3841_v22 }
 0x3b3   : > { %3613 = vmatmul.msk.bf16.gmra.mxu2 %vm4651_vm4, %v3612_v51  ;;  %3625 = vmatmul.msk.bf16.gmra.mxu0 %vm4678_vm5, %v3624_v26 }
 0x3b4   : > { %2886 = vmatpush.bf16.msra.mxu3 %v3849_v24 }
 0x3b5   : > { %2868 = vmatpush.bf16.msra.mxu2 %v3840_v50 }
 0x3b8   : > { %2887 = vmatpush.bf16.msra.mxu3 %v3848_v29 }
 0x3b9   : > { %2869 = vmatpush.bf16.msra.mxu2 %v3839_v11 }
 0x3bc   : > { %2888 = vmatpush.bf16.msra.mxu3 %v3847_v36 }
 0x3bd   : > { %2870 = vmatpush.bf16.msra.mxu2 %v3838_v49 }
 0x3c0   : > { %2889 = vmatpush.bf16.msra.mxu3 %v3846_v54 }
 0x3c1   : > { %2871 = vmatpush.bf16.msra.mxu2 %v3837_v60 }
 0x3c4   : > { %2890 = vmatpush.bf16.msra.mxu3 %v3845_v61 }
 0x3c5   : > { %2872 = vmatpush.bf16.msra.mxu2 %v3836_v2 }
 0x3c8   : > { %2891 = vmatpush.bf16.msra.mxu3 %v3844_v13 }
 0x400   : > { %v2545_v40 = vpop.f32.mrf.mxu0 }
 0x403   : > { %v2516_v32 = vpop.f32.mrf.mxu3 }
 0x406   : > { %v2487_v37 = vpop.f32.mrf.mxu2 }
 0x407   : > { %v2517_v45 = vadd.f32 %v2516_v32, %v2487_v37 }
 0x408   : > { %v2547_v48 = vpop.f32.mrf.mxu0 }
 0x409   : > { %v2546_v56 = vadd.f32 %v2545_v40, %v2517_v45 }
 0x40b   : > { %v2569_v35 = vmul.f32 %v5179_v47, %v2546_v56  ;;  %v2518_v12 = vpop.f32.mrf.mxu3 }
 0x40d   : > { %v2581_v14 = vadd.f32 %v5184_v42, %v2569_v35 }
 0x40e   : > { %v2489_v62 = vpop.f32.mrf.mxu2 }
 0x40f   : > { %v2589_v0 = vadd.f32 %v2581_v14, %v5044_v52  ;;  %v2519_v44 = vadd.f32 %v2518_v12, %v2489_v62 }
 0x410   : > { %v2550_v19 = vpop.f32.mrf.mxu0 }
 0x411   : > { %v2597_v3 = vmax.f32 %v2589_v0, 0.0  ;;  %v2548_v4 = vadd.f32 %v2547_v48, %v2519_v44 }
 0x413   : > { %2605 = vst [vmem:[%s5191_s17] sm:$0xff] %v2597_v3  ;;  %v2570_v53 = vmul.f32 %v5179_v47, %v2548_v4  ;;  %v2521_v5 = vpop.f32.mrf.mxu3 }
 0x415   : > { %v2582_v52 = vadd.f32 %v5184_v42, %v2570_v53 }
 0x416   : > { %v2492_v6 = vpop.f32.mrf.mxu2 }
 0x417   : > { %v2590_v10 = vadd.f32 %v2582_v52, %v5048_v21  ;;  %v2522_v59 = vadd.f32 %v2521_v5, %v2492_v6 }
 0x418   : > { %v2552_v7 = vpop.f32.mrf.mxu0 }
 0x419   : > { %v2598_v20 = vmax.f32 %v2590_v10, 0.0  ;;  %v2551_v46 = vadd.f32 %v2550_v19, %v2522_v59 }
 0x41b   : > { %2606 = vst [vmem:[%s5191_s17 + $0x8] sm:$0xff] %v2598_v20  ;;  %v2571_v18 = vmul.f32 %v5179_v47, %v2551_v46  ;;  %v2523_v8 = vpop.f32.mrf.mxu3 }
 0x41d   : > { %v2583_v25 = vadd.f32 %v5184_v42, %v2571_v18 }
 0x41e   : > { %v2494_v31 = vpop.f32.mrf.mxu2 }
 0x41f   : > { %v2591_v51 = vadd.f32 %v2583_v25, %v5065_v16  ;;  %v2524_v26 = vadd.f32 %v2523_v8, %v2494_v31 }
 0x420   : > { %v2555_v34 = vpop.f32.mrf.mxu0 }
 0x421   : > { %v2599_v27 = vmax.f32 %v2591_v51, 0.0  ;;  %v2553_v41 = vadd.f32 %v2552_v7, %v2524_v26 }
 0x422   : > { %v3629_v37 = vld [vmem:[%s5191_s17 + $0x1] ss:$2 sm:$0xff]  ;;  %v2613_v45 = vld [vmem:[%s5191_s17] ss:$2 sm:$0xff] }
 0x423   : > { %2607 = vst [vmem:[%s5191_s17 + $0x10] sm:$0xff] %v2599_v27  ;;  %v2572_v21 = vmul.f32 %v5179_v47, %v2553_v41  ;;  %v2526_v9 = vpop.f32.mrf.mxu3  ;;  %v2632_v54 = vrot.slane %v3629_v37, 7 }
 0x425   : > { %v2584_v1 = vadd.f32 %v5184_v42, %v2572_v21 }
 0x426   : > { %v2497_v17 = vpop.f32.mrf.mxu2 }
 0x427   : > { %v2592_v22 = vadd.f32 %v2584_v1, %v5070_v15  ;;  %v2527_v24 = vadd.f32 %v2526_v9, %v2497_v17 }
 0x428   : > { %v2557_v29 = vpop.f32.mrf.mxu0 }
 0x429   : > { %v2600_v38 = vmax.f32 %v2592_v22, 0.0  ;;  %v2556_v16 = vadd.f32 %v2555_v34, %v2527_v24 }
 0x42b   : > { %2608 = vst [vmem:[%s5191_s17 + $0x18] sm:$0xff] %v2600_v38  ;;  %v2573_v40 = vmul.f32 %v5179_v47, %v2556_v16  ;;  %v2528_v50 = vpop.f32.mrf.mxu3 }
 0x42d   : > { %v2585_v30 = vadd.f32 %v5184_v42, %v2573_v40 }
 0x42e   : > { %v2499_v32 = vpop.f32.mrf.mxu2 }
 0x42f   : > { %v2593_v11 = vadd.f32 %v2585_v30, %v5087_v55  ;;  %v2529_v36 = vadd.f32 %v2528_v50, %v2499_v32 }
 0x430   : > { %v2560_v14 = vpop.f32.mrf.mxu0 }
 0x431   : > { %v2601_v39 = vmax.f32 %v2593_v11, 0.0  ;;  %v2558_v15 = vadd.f32 %v2557_v29, %v2529_v36 }
 0x432   : > { %v3626_v48 = vld [vmem:[%s5191_s17 + $0x10] ss:$2 sm:$0xff]  ;;  %v3630_v49 = vld [vmem:[%s5191_s17 + $0x11] ss:$2 sm:$0xff] }
 0x433   : > { %2609 = vst [vmem:[%s5191_s17 + $0x20] sm:$0xff] %v2601_v39  ;;  %v2574_v56 = vmul.f32 %v5179_v47, %v2558_v15  ;;  %v2645_v57 = vpack.c.bf16 %v3626_v48, %v2613_v45  ;;  %v2633_v35 = vrot.slane %v3630_v49, 7  ;;  %v2646_v12 = vpack.c.bf16 %v3630_v49, %v3629_v37  ;;  %v2531_v60 = vpop.f32.mrf.mxu3 }
 0x435   : > { %v2586_v55 = vadd.f32 %v5184_v42, %v2574_v56  ;;  %2873 = vmatmul.bf16.vlgmr.msra.gmra.mxu2 %v2645_v57  ;;  %v3732_v61 = vpack.c.bf16 %v2633_v35, %v2632_v54  ;;  %2892 = vmatmul.bf16.vlgmr.msra.gmra.mxu3 %v2646_v12 }
 0x436   : > { %v2502_v62 = vpop.f32.mrf.mxu2 }
 0x437   : > { %v2594_v63 = vadd.f32 %v2586_v55, %v5092_v58  ;;  %v2532_v0 = vadd.f32 %v2531_v60, %v2502_v62  ;;  %3733 = vmatmul.msk.bf16.vlgmr.msrb.gmra.mxu1 %vm3731_vm6, %v3732_v61 }
 0x438   : > { %v2562_v53 = vpop.f32.mrf.mxu0 }
 0x439   : > { %v2602_v44 = vmax.f32 %v2594_v63, 0.0  ;;  %v2561_v19 = vadd.f32 %v2560_v14, %v2532_v0 }
 0x43b   : > { %2610 = vst [vmem:[%s5191_s17 + $0x28] sm:$0xff] %v2602_v44  ;;  %v2575_v2 = vmul.f32 %v5179_v47, %v2561_v19  ;;  %v2533_v3 = vpop.f32.mrf.mxu3 }
 0x43d   : > { %v2587_v13 = vadd.f32 %v5184_v42, %v2575_v2 }
 0x43e   : > { %v2504_v58 = vpop.f32.mrf.mxu2 }
 0x43f   : > { %v2595_v4 = vadd.f32 %v2587_v13, %v5109_v23  ;;  %v2534_v43 = vadd.f32 %v2533_v3, %v2504_v58 }
 0x441   : > { %v2603_v5 = vmax.f32 %v2595_v4, 0.0  ;;  %v2563_v52 = vadd.f32 %v2562_v53, %v2534_v43 }
 0x442   : > { %v3631_v20 = vld [vmem:[%s5191_s17 + $0x21] ss:$2 sm:$0xff]  ;;  %v3627_v46 = vld [vmem:[%s5191_s17 + $0x20] ss:$2 sm:$0xff] }
 0x443   : > { %2611 = vst [vmem:[%s5191_s17 + $0x30] sm:$0xff] %v2603_v5  ;;  %v2576_v6 = vmul.f32 %v5179_v47, %v2563_v52  ;;  %v2634_v25 = vrot.slane %v3631_v20, 7 }
 0x445   : > { %v2588_v10 = vadd.f32 %v5184_v42, %v2576_v6 }
 0x447   : > { %v2596_v59 = vadd.f32 %v2588_v10, %v5112_v28 }
 0x449   : > { %v2604_v7 = vmax.f32 %v2596_v59, 0.0 }
 0x44b   : > { %2612 = vst [vmem:[%s5191_s17 + $0x38] sm:$0xff] %v2604_v7 }
 0x452   : > { %v3628_v18 = vld [vmem:[%s5191_s17 + $0x30] ss:$2 sm:$0xff]  ;;  %v3632_v23 = vld [vmem:[%s5191_s17 + $0x31] ss:$2 sm:$0xff] }
 0x453   : > { %v2648_v8 = vpack.c.bf16 %v3628_v18, %v3627_v46  ;;  %v2635_v31 = vrot.slane %v3632_v23, 7  ;;  %v2649_v51 = vpack.c.bf16 %v3632_v23, %v3631_v20 }
 0x455   : > { %2878 = vmatmul.bf16.gmra.mxu2 %v2648_v8  ;;  %2897 = vmatmul.bf16.gmra.mxu3 %v2649_v51  ;;  %v3737_v47 = vpack.c.bf16 %v2635_v31, %v2634_v25 }
 0x457   : > { %3738 = vmatmul.msk.bf16.gmra.mxu1 %vm3731_vm6, %v3737_v47 }
 0x458   : > { %4183 = shalt.err (!%p4180_p9)
}
 0x459   : > { %s5367_s9 = smov 128   ;;  %s4310_s17 = smov 8  }
 0x45a   : > { %3878 = dma.vmem_to_hbm [thread:$0]  (%p4492_p3), %s2954_s13, 1024, %s2956_s22, %s5251_s2, %s5367_s9, %s5367_s9, %s4310_s17  }
 0x45b   : > { %s5411_s15 = sld [smem:[#allocation40_spill]]  ;;  %s2935_s25 = sshll.u32 %s4889_s7, 4  ;;  %s2936_s25 = int_to_ptr.vmem [resolvable:$true] %s2935_s25 }
 0x45c   : > { %s2912_s16 = scalar_lea.sflag [#allocation4], %s4546_s11 }
 0x461   : > { %s2934_s19 = scalar_lea.hbm %s5411_s15, %s3853_s21  ;;  %s4204_s13 = scalar_lea.hbm %s5411_s15, 256 }
 0x462   : > { %s2937_s18 = sshll.u32 %s2934_s19, 4  ;;  %s2938_s18 = int_to_ptr.hbm [resolvable:$true] %s2937_s18 }
 0x463   : > { %s4198_s1 = sshra.s32 %s2938_s18, 4  ;;  %s4199_s1 = int_to_ptr.hbm [resolvable:$true] %s4198_s1 }
 0x464   : > { %s4200_s27 = scalar_lea.hbm %s4199_s1, 128  ;;  %p4205_p5 = scmp.lt.s32.totalorder %s4199_s1, %s5411_s15 }
 0x465   : > { %p4201_p12 = scmp.ne.s32.totalorder %s4199_s1, %s4200_s27  ;;  %p4206_p7 = scmp.lt.s32.totalorder %s4204_s13, %s4200_s27 }
 0x467   : > { %p4202_p13 = pnand %p4201_p12, %p4492_p3  ;;  %p4207_p1 = por %p4206_p7, %p4205_p5 }
 0x469   : > { %p4203_p0 = pneg %p4202_p13 }
 0x46b   : > { %p4208_p4 = pnand %p4207_p1, %p4203_p0 }
 0x46d   : > { %4211 = shalt.err (!%p4208_p4)
}
 0x46e   : > { %s5412_s7 = smov 128   ;;  %s5413_s23 = sld [smem:[#allocation39_spill]] }
 0x46f   : > { %3877 = dma.vmem_to_hbm [thread:$0]  (%p4492_p3), %s2936_s25, 2048, %s2938_s18, %s2912_s16, %s5412_s7, %s5412_s7, %s4310_s17  }
 0x470   : > { %s3194_s9 = sshll.u32 %s4546_s11, 5  ;;  %s3856_s11 = sshll.u32 %s4427_s0, 5 }
 0x471   : > { %s5289_s19 = scalar_lea.vmem [#allocation16], %s3194_s9  ;;  %s5414_s16 = sld [smem:[#allocation42_spill]] }
 0x472   : > { %s2970_s27 = sshll.u32 %s5289_s19, 4  ;;  %s2971_s27 = int_to_ptr.vmem [resolvable:$true] %s2970_s27 }
 0x474   : > { %v3975_v33 = vld [vmem:[%s5413_s23] ss:$0 sm:$0xff] }
 0x477   : > { %s2969_s1 = scalar_lea.hbm %s5414_s16, %s3856_s11  ;;  %s4232_s21 = scalar_lea.hbm %s5414_s16, 64 }
 0x478   : > { %s2972_s20 = sshll.u32 %s2969_s1, 4  ;;  %s2973_s20 = int_to_ptr.hbm [resolvable:$true] %s2972_s20 }
 0x479   : > { %s4226_s26 = sshra.s32 %s2973_s20, 4  ;;  %s4227_s26 = int_to_ptr.hbm [resolvable:$true] %s4226_s26 }
 0x47a   : > { %s4228_s0 = scalar_lea.hbm %s4227_s26, 32  ;;  %p4233_p11 = scmp.lt.s32.totalorder %s4227_s26, %s5414_s16 }
 0x47b   : > { %p4229_p8 = scmp.ne.s32.totalorder %s4227_s26, %s4228_s0  ;;  %p4234_p9 = scmp.lt.s32.totalorder %s4232_s21, %s4228_s0 }
 0x47d   : > { %p4230_p2 = pnand %p4229_p8, %p4492_p3  ;;  %p4235_p12 = por %p4234_p9, %p4233_p11 }
 0x47f   : > { %p4231_p10 = pneg %p4230_p2 }
 0x481   : > { %p4236_p13 = pnand %p4235_p12, %p4231_p10 }
 0x4b4   : > { %v2855_v28 = vpop.f32.mrf.mxu1 }
 0x4b5   : > { %v2856_v42 = vadd.f32 %v3975_v33, %v2855_v28 }
 0x4b8   : > { %v2874_v26 = vpop.f32.mrf.mxu2  ;;  %v2893_v27 = vpop.f32.mrf.mxu3 }
 0x4b9   : > { %v2875_v41 = vadd.f32 %v2874_v26, %v2856_v42 }
 0x4bb   : > { %v2894_v34 = vadd.f32 %v2893_v27, %v2875_v41 }
 0x4bc   : > { %v2857_v21 = vpop.f32.mrf.mxu1 }
 0x4bd   : > { %v2903_v9 = vmax.f32 %v2894_v34, 0.0  ;;  %v2858_v1 = vadd.f32 %v3975_v33, %v2857_v21 }
 0x4bf   : > { %2907 = vst [vmem:[%s5289_s19] sm:$0xff] %v2903_v9 }
 0x4c0   : > { %v2876_v17 = vpop.f32.mrf.mxu2  ;;  %v2895_v24 = vpop.f32.mrf.mxu3 }
 0x4c1   : > { %v2877_v22 = vadd.f32 %v2876_v17, %v2858_v1 }
 0x4c3   : > { %v2896_v38 = vadd.f32 %v2895_v24, %v2877_v22 }
 0x4c5   : > { %v2904_v16 = vmax.f32 %v2896_v38, 0.0 }
 0x4c7   : > { %2908 = vst [vmem:[%s5289_s19 + $0x8] sm:$0xff] %v2904_v16 }
 0x4d4   : > { %v2860_v40 = vpop.f32.mrf.mxu1 }
 0x4d5   : > { %v2861_v50 = vadd.f32 %v3975_v33, %v2860_v40 }
 0x4d8   : > { %v2879_v29 = vpop.f32.mrf.mxu2  ;;  %v2898_v30 = vpop.f32.mrf.mxu3 }
 0x4d9   : > { %v2880_v32 = vadd.f32 %v2879_v29, %v2861_v50 }
 0x4db   : > { %v2899_v11 = vadd.f32 %v2898_v30, %v2880_v32 }
 0x4dc   : > { %v2862_v36 = vpop.f32.mrf.mxu1 }
 0x4dd   : > { %v2905_v37 = vmax.f32 %v2899_v11, 0.0  ;;  %v2863_v39 = vadd.f32 %v3975_v33, %v2862_v36 }
 0x4df   : > { %2909 = vst [vmem:[%s5289_s19 + $0x10] sm:$0xff] %v2905_v37 }
 0x4e0   : > { %v2881_v15 = vpop.f32.mrf.mxu2  ;;  %v2900_v48 = vpop.f32.mrf.mxu3 }
 0x4e1   : > { %v2882_v45 = vadd.f32 %v2881_v15, %v2863_v39 }
 0x4e3   : > { %v2901_v49 = vadd.f32 %v2900_v48, %v2882_v45 }
 0x4e5   : > { %v2906_v54 = vmax.f32 %v2901_v49, 0.0 }
 0x4e7   : > { %2910 = vst [vmem:[%s5289_s19 + $0x18] sm:$0xff] %v2906_v54 }
 0x4e8   : > { %4239 = shalt.err (!%p4236_p13)
}
 0x4e9   : > { %3879 = dma.vmem_to_hbm [thread:$0]  (%p4492_p3), %s2971_s27, 512, %s2973_s20, %s5251_s2, %s5412_s7, %s5412_s7, %s4310_s17  }
 0x4ea PF: > { %s5415_s9 = sld [smem:[#allocation24_spill]]  ;;  %p5417_p0 = scmp.ge.s32.totalorder %s4298_s30, 2 }
 0x4ec   : > { %p3904_p5 = pnand %p5417_p0, %p4443_p6 }
 0x4ee   : > { %p3905_p7 = pneg %p3904_p5 }
 0x4f0   : > { %s2987_s11 = sand.u32 1, %s5415_s9  }
 0x4f1   : > { %s2988_s25 = scalar_lea.sflag [#allocation4], %s2987_s11 }
 0x4f2   : > { %4277 = dma.done.wait (%p3905_p7), %s2988_s25, 2048  }
 0x4f3   : > { %4279 = vsyncadd (%p3905_p7), %s2988_s25, 4294965248  ;;  %s5418_s18 = sadd.s32 4294967294, %s4298_s30  }
 0x4f4   : > { %s2997_s24 = sand.u32 1, %s5418_s18  }
 0x4f5   : > { %s2998_s1 = scalar_lea.sflag [#allocation15], %s2997_s24 }
 0x4f6   : > { %4281 = dma.done.wait (%p3905_p7), %s2998_s1, 1536  }
 0x4f7   : > { %4283 = vsyncadd (%p3905_p7), %s2998_s1, 4294965760  ;;  %s5419_s30 = sld [smem:[#allocation27_spill]]  ;;  %s5422_s27 = smov %s4290_s28 }
 0x4f8   : > { %s5420_s2 = sld [smem:[#allocation25_spill]] }
 0x4f9   : > { %s5421_s29 = sld [smem:[#allocation29_spill]] }
 0x4fd   : > { %p40_p3 = scmp.ge.s32.totalorder %s5419_s30, 4  }
 0x4fe   : > { %s5423_s28 = smov %s5420_s2 }
 0x4ff   :  { %42 = sbr.rel (!%p40_p3) target bundleno = 25 (0x19), region = 212 }
 0x504   :  { %3014 = vsyncpa [#allocation3], 1 }
 0x505   :  { %3016 = vsyncpa [#allocation3 + $0x1], 1 }
 0x506   :  { %3017 = vsyncpa [#allocation6], 1 }
 0x507   :  { %3019 = vsyncpa [#allocation6 + $0x1], 1 }
 0x508   :  { %3020 = vsyncpa [#allocation9], 1 }
 0x509   :  { %3021 = vsyncpa [#allocation12], 1 }
 0x50a   :  { %3022 = vsyncpa [#allocation4], 1 }
 0x50b   :  { %3024 = vsyncpa [#allocation4 + $0x1], 1 }
 0x50c   :  { %3025 = vsyncpa [#allocation15], 1 }
 0x50d   :  { %3027 = vsyncpa [#allocation15 + $0x1], 1 }

</bundles_post_ra>
